<compile_context>
chip_gen: v7x
topology: tpu7x:2x2x1
jax: 0.10.0
libtpu: 0.0.40
codegen_flags: <defaults>
</compile_context>

<pallas_src>
import math
import numpy as np
import jax
import jax.numpy as jnp
from jax.experimental import pallas as pl
from jax.experimental.pallas import tpu as pltpu

# ----- synthetic BERT hyper-parameters (small, consistent with the module) ----
B = 2             # sentences in the batch
S = 8             # max subword length (max_sent after truncation)
H = 32            # hidden size (logical)
NH = 4            # attention heads
DH = H // NH      # head dim (logical)
FF = 64           # FFN intermediate size (logical)
L = 2             # encoder layers
V = 50            # vocab size
MAXLEN = 16       # position-embedding table size (self.max_len)
LN_EPS = 1e-12
NEG = -10000.0    # classic HF BERT additive attention-mask bias

# ----- TPU-friendly padded sizes ----------------------------------------------
HP = 128                  # hidden padded to full lane width
FFP = 128                 # FFN intermediate padded to full lane width
QKVP = 128                # dense fused Q|K|V width: 3*H = 96 padded to 128 lanes
R = B * S                 # tokens in the batch (rows / sublanes)


# ------------------------------ kernels ---------------------------------------
def _layer_norm(x, gamma, beta, feat_mask):
    # Two-pass variance; padded lanes (>= H) of x are exactly zero and are
    # masked out of the centered term, so statistics are over the real H
    # features only.  gamma/beta are zero-padded => padded output lanes stay 0.
    mean = jnp.sum(x, axis=-1, keepdims=True) * (1.0 / H)
    cen = jnp.where(feat_mask, x - mean, 0.0)
    var = jnp.sum(cen * cen, axis=-1, keepdims=True) * (1.0 / H)
    return cen * jax.lax.rsqrt(var + LN_EPS) * gamma + beta


def bert_encoder_kernel(emb_ref, bias_ref, onehot_ref, g0_ref, b0_ref,
                        wqkv_ref, bqkv_ref, wo_ref, bo_ref,
                        g1_ref, b1n_ref, w1_ref, bi1_ref,
                        w2_ref, bi2_ref, g2_ref, b2n_ref,
                        out_ref, x_scr):
    f32 = jnp.float32
    bf16 = jnp.bfloat16
    l = pl.program_id(0)

    feat_mask = jax.lax.broadcasted_iota(jnp.int32, (1, HP), 1) < H

    # Embedding LayerNorm fused as the prologue of layer 0; x_scr is the
    # VMEM-resident activation carried across all L grid steps (never hits HBM).
    @pl.when(l == 0)
    def _():
        x_scr[...] = _layer_norm(emb_ref[...], g0_ref[...], b0_ref[...], feat_mask)

    x = x_scr[...]             # (R, HP) f32
    bias = bias_ref[...]       # (R, R) additive mask: padding + cross-sentence

    # Single dense fused QKV projection: (R, HP)bf16 @ (HP, 128)bf16 -> f32.
    # Q occupies lanes [0, H), K [H, 2H), V [2H, 3H); head h = 8-lane sub-slice.
    qkv = (jnp.dot(x.astype(bf16), wqkv_ref[0], preferred_element_type=f32)
           + bqkv_ref[0])                                    # (R, 128) f32

    scale = 1.0 / math.sqrt(DH)
    ctx_heads = []
    # Static unroll over NH heads; softmax math stays in f32.
    for h in range(NH):
        q_h = qkv[:, h * DH:(h + 1) * DH]
        k_h = qkv[:, H + h * DH:H + (h + 1) * DH]
        v_h = qkv[:, 2 * H + h * DH:2 * H + (h + 1) * DH]
        s = jax.lax.dot_general(q_h, k_h, (((1,), (1,)), ((), ())),
                                preferred_element_type=f32) * scale + bias
        s = s - jnp.max(s, axis=-1, keepdims=True)
        p = jnp.exp(s)
        p = p * pl.reciprocal(jnp.sum(p, axis=-1, keepdims=True), approx=True)
        ctx_heads.append(jnp.dot(p, v_h, preferred_element_type=f32))
    # Dense (R, H) context (heads packed into 32 lanes), single Wo matmul.
    ctx = jnp.concatenate(ctx_heads, axis=-1)                # (R, H) f32
    attn = (jnp.dot(ctx.astype(bf16), wo_ref[0], preferred_element_type=f32)
            + bo_ref[0])                                     # (R, HP) f32
    x1 = _layer_norm(x + attn, g1_ref[0], b1n_ref[0], feat_mask)

    hmid = (jnp.dot(x1.astype(bf16), w1_ref[0], preferred_element_type=f32)
            + bi1_ref[0])
    # TODO(synk): HF BERT uses exact erf-GELU; tanh-approx GELU used for robust Mosaic lowering.
    hmid = jax.nn.gelu(hmid, approximate=True)
    ffn = (jnp.dot(hmid.astype(bf16), w2_ref[0], preferred_element_type=f32)
           + bi2_ref[0])
    x_scr[...] = _layer_norm(x1 + ffn, g2_ref[0], b2n_ref[0], feat_mask)

    # Fused masked_select epilogue: one-hot row-selection as a single MXU matmul
    # with a full-width unmasked store, only on the last layer step.
    @pl.when(l == pl.num_programs(0) - 1)
    def _():
        out_ref[...] = jnp.dot(onehot_ref[...], x_scr[...],
                               preferred_element_type=f32)


# ------------------------------ wrappers ---------------------------------------
def bert_encode_and_gather(emb_p, bias, onehot, packed, p_pad):
    g0 = packed['emb_ln_g']
    b0 = packed['emb_ln_b']
    layer_names = ('wqkv', 'bqkv', 'wo', 'bo', 'ln1_g', 'ln1_b',
                   'w1', 'b1', 'w2', 'b2', 'ln2_g', 'ln2_b')
    layer_arrays = [packed[n] for n in layer_names]

    def full_spec(a):
        nd = a.ndim
        return pl.BlockSpec(a.shape, lambda l, nd=nd: (0,) * nd)

    def layer_spec(a):
        nd = a.ndim
        return pl.BlockSpec((1,) + a.shape[1:],
                            lambda l, nd=nd: (l,) + (0,) * (nd - 1))

    in_specs = ([full_spec(a) for a in (emb_p, bias, onehot, g0, b0)]
                + [layer_spec(a) for a in layer_arrays])

    return pl.pallas_call(
        bert_encoder_kernel,
        out_shape=jax.ShapeDtypeStruct((p_pad, HP), jnp.float32),
        grid=(L,),
        in_specs=in_specs,
        # Constant block index => the gathered-output block stays resident in
        # VMEM across the layer loop and is written back to HBM exactly once.
        out_specs=pl.BlockSpec((p_pad, HP), lambda l: (0, 0)),
        scratch_shapes=[pltpu.VMEM((R, HP), jnp.float32)],   # layer carry
        compiler_params=pltpu.CompilerParams(dimension_semantics=("arbitrary",)),
    )(emb_p, bias, onehot, g0, b0, *layer_arrays)


# ------------------------------ params & packing -------------------------------
def init_params(key):
    keys = jax.random.split(key, 4 + L)

    def nrm(k, shape):
        return 0.02 * jax.random.normal(k, shape, dtype=jnp.float32)

    params = {
        'word_emb': nrm(keys[0], (V, H)),
        'pos_emb': nrm(keys[1], (MAXLEN, H)),
        'type_emb': nrm(keys[2], (2, H)),
        'emb_ln_g': jnp.ones((H,), jnp.float32),
        'emb_ln_b': jnp.zeros((H,), jnp.float32),
        'layers': [],
    }
    for l in range(L):
        lk = jax.random.split(keys[4 + l], 6)
        params['layers'].append({
            'wq': nrm(lk[0], (H, H)), 'bq': jnp.zeros((H,), jnp.float32),
            'wk': nrm(lk[1], (H, H)), 'bk': jnp.zeros((H,), jnp.float32),
            'wv': nrm(lk[2], (H, H)), 'bv': jnp.zeros((H,), jnp.float32),
            'wo': nrm(lk[3], (H, H)), 'bo': jnp.zeros((H,), jnp.float32),
            'ln1_g': jnp.ones((H,), jnp.float32), 'ln1_b': jnp.zeros((H,), jnp.float32),
            'w1': nrm(lk[4], (H, FF)), 'b1': jnp.zeros((FF,), jnp.float32),
            'w2': nrm(lk[5], (FF, H)), 'b2': jnp.zeros((H,), jnp.float32),
            'ln2_g': jnp.ones((H,), jnp.float32), 'ln2_b': jnp.zeros((H,), jnp.float32),
        })
    return params


def pack_params(params):
    """Densely pack weights (bf16), pad to lane widths, fuse QKV, stack layers."""
    bf16 = jnp.bfloat16

    def pad_row(v, width):
        return jnp.zeros((1, width), jnp.float32).at[0, :v.shape[0]].set(v)

    packed = {
        'emb_ln_g': pad_row(params['emb_ln_g'], HP),
        'emb_ln_b': pad_row(params['emb_ln_b'], HP),
    }
    names = ['wqkv', 'bqkv', 'wo', 'bo', 'ln1_g', 'ln1_b',
             'w1', 'b1', 'w2', 'b2', 'ln2_g', 'ln2_b']
    acc = {n: [] for n in names}

    for lp in params['layers']:
        # Dense fused QKV: Q at lanes [0,H), K at [H,2H), V at [2H,3H); head h is
        # the natural 8-lane sub-slice of each 32-lane group.
        wqkv = jnp.zeros((HP, QKVP), jnp.float32)
        bqkv = jnp.zeros((1, QKVP), jnp.float32)
        for t, (wn, bn) in enumerate((('wq', 'bq'), ('wk', 'bk'), ('wv', 'bv'))):
            wqkv = wqkv.at[:H, t * H:(t + 1) * H].set(lp[wn])
            bqkv = bqkv.at[0, t * H:(t + 1) * H].set(lp[bn])
        wo = jnp.zeros((H, HP), jnp.float32).at[:, :H].set(lp['wo'])

        acc['wqkv'].append(wqkv.astype(bf16))
        acc['bqkv'].append(bqkv)
        acc['wo'].append(wo.astype(bf16))
        acc['bo'].append(pad_row(lp['bo'], HP))
        acc['ln1_g'].append(pad_row(lp['ln1_g'], HP))
        acc['ln1_b'].append(pad_row(lp['ln1_b'], HP))
        acc['w1'].append(jnp.zeros((HP, FFP), jnp.float32)
                         .at[:H, :FF].set(lp['w1']).astype(bf16))
        acc['b1'].append(pad_row(lp['b1'], FFP))
        acc['w2'].append(jnp.zeros((FFP, HP), jnp.float32)
                         .at[:FF, :H].set(lp['w2']).astype(bf16))
        acc['b2'].append(pad_row(lp['b2'], HP))
        acc['ln2_g'].append(pad_row(lp['ln2_g'], HP))
        acc['ln2_b'].append(pad_row(lp['ln2_b'], HP))

    for n in names:
        packed[n] = jnp.stack(acc[n])    # (L, ...)
    return packed


# ------------------------------ forward -----------------------------------------
def build_attn_bias(input_mask):
    # HF-style additive key mask (1-mask)*-10000, plus a block-diagonal term so
    # folding the batch into one (B*S) token axis cannot attend across sentences
    # (exp(-1e4 - rowmax) underflows to exactly 0 in f32).
    m = input_mask.reshape(-1).astype(jnp.float32)                 # (R,)
    sent = jnp.repeat(jnp.arange(B, dtype=jnp.int32), S)           # (R,)
    same = (sent[:, None] == sent[None, :]).astype(jnp.float32)    # (R, R)
    key_ok = same * m[None, :]
    return (1.0 - key_ok) * NEG                                    # (R, R)


def build_onehot(idx, p_pad):
    # One-hot row-selection matrix for the fused gather epilogue; padded rows
    # use index -1 => all-zero rows (dropped in the wrapper).
    idx_p = jnp.full((p_pad,), -1, jnp.int32).at[:idx.shape[0]].set(idx)
    rows = jnp.arange(R, dtype=jnp.int32)[None, :]                 # (1, R)
    return (idx_p[:, None] == rows).astype(jnp.float32)            # (p_pad, R)


def word_level_bert_forward(params, packed, input_ids, input_mask, end_mask_np):
    # BERT embeddings: word + position + token-type (all type 0).
    emb = (params['word_emb'][input_ids]
           + params['pos_emb'][:S][None, :, :]
           + params['type_emb'][0][None, None, :])                 # (B, S, H)
    emb_p = jnp.zeros((R, HP), jnp.float32).at[:, :H].set(emb.reshape(R, H))

    bias = build_attn_bias(input_mask)

    # Word-level packing: keep rows where end_mask == 1 (masked_select semantics).
    # TODO(synk): indices from the host-side numpy end_mask (np.nonzero) => the
    # packed output length is data-dependent, as in the original module.
    idx = np.nonzero(end_mask_np.reshape(-1))[0].astype(np.int32)
    p = int(idx.shape[0])
    p_pad = max(8, ((p + 7) // 8) * 8)                             # sublane-pad
    onehot = build_onehot(jnp.asarray(idx), p_pad)

    out_p = bert_encode_and_gather(emb_p, bias, onehot, packed, p_pad)  # (p_pad, HP)
    return out_p[:p, :H]                                           # drop padding


# ------------------------------ main -------------------------------------------
if __name__ == "__main__":
    key = jax.random.PRNGKey(0)
    pkey, idkey = jax.random.split(key)
    params = init_params(pkey)
    packed = pack_params(params)

    # Synthetic "tokenization" of 2 sentences with last-subword markers:
    #   sent 0: [CLS] w1a w1b w2 w3a w3b [SEP]  -> 3 words (+2 for CLS/SEP)
    #   sent 1: [CLS] w1  w2a w2b w2c   [SEP]   -> 2 words (+2 for CLS/SEP)
    input_ids = np.zeros((B, S), dtype=np.int32)
    input_mask = np.zeros((B, S), dtype=np.int32)
    end_mask = np.zeros((B, S), dtype=np.int32)
    tok_ids = np.asarray(jax.random.randint(idkey, (B, S), 4, V), dtype=np.int32)
    lens = [7, 6]
    ends = [[1, 0, 1, 1, 0, 1, 1], [1, 1, 0, 0, 1, 1]]
    for b, (n, em) in enumerate(zip(lens, ends)):
        input_ids[b, :n] = tok_ids[b, :n]
        input_ids[b, 0] = 2       # [CLS]
        input_ids[b, n - 1] = 3   # [SEP]
        input_mask[b, :n] = 1
        end_mask[b, :n] = em
    packed_len = int(end_mask.sum())   # include_clssep=True

    out = word_level_bert_forward(params, packed,
                                  jnp.asarray(input_ids),
                                  jnp.asarray(input_mask),
                                  end_mask)
    out = jax.block_until_ready(out)
    assert out.shape == (packed_len, H), (out.shape, packed_len)
    assert bool(jnp.all(jnp.isfinite(out)))
    print("KERNEL_OK")
</pallas_src>

<mosaic_0001>
module attributes {stable_mosaic.version = 11 : i64} {
  func.func @bert_encoder_kernel(%arg0: i32, %arg1: memref<16x128xf32, #tpu.memory_space<vmem>>, %arg2: memref<16x16xf32, #tpu.memory_space<vmem>>, %arg3: memref<16x16xf32, #tpu.memory_space<vmem>>, %arg4: memref<1x128xf32, #tpu.memory_space<vmem>>, %arg5: memref<1x128xf32, #tpu.memory_space<vmem>>, %arg6: memref<1x128x128xbf16, #tpu.memory_space<vmem>>, %arg7: memref<1x1x128xf32, #tpu.memory_space<vmem>>, %arg8: memref<1x32x128xbf16, #tpu.memory_space<vmem>>, %arg9: memref<1x1x128xf32, #tpu.memory_space<vmem>>, %arg10: memref<1x1x128xf32, #tpu.memory_space<vmem>>, %arg11: memref<1x1x128xf32, #tpu.memory_space<vmem>>, %arg12: memref<1x128x128xbf16, #tpu.memory_space<vmem>>, %arg13: memref<1x1x128xf32, #tpu.memory_space<vmem>>, %arg14: memref<1x128x128xbf16, #tpu.memory_space<vmem>>, %arg15: memref<1x1x128xf32, #tpu.memory_space<vmem>>, %arg16: memref<1x1x128xf32, #tpu.memory_space<vmem>>, %arg17: memref<1x1x128xf32, #tpu.memory_space<vmem>>, %arg18: memref<16x128xf32, #tpu.memory_space<vmem>>, %arg19: memref<16x128xf32, #tpu.memory_space<vmem>>) attributes {dimension_semantics = [#tpu.dimension_semantics<arbitrary>], iteration_bounds = array<i64: 2>, scalar_prefetch = 0 : i64, scratch_operands = 1 : i64, tpu.core_type = #tpu.core_type<tc>, window_params = [{pipeline_mode = #tpu.pipeline_mode<synchronous>, transform_indices = @transform_0, window_bounds = array<i64: 16, 128>}, {pipeline_mode = #tpu.pipeline_mode<synchronous>, transform_indices = @transform_1, window_bounds = array<i64: 16, 16>}, {pipeline_mode = #tpu.pipeline_mode<synchronous>, transform_indices = @transform_2, window_bounds = array<i64: 16, 16>}, {pipeline_mode = #tpu.pipeline_mode<synchronous>, transform_indices = @transform_3, window_bounds = array<i64: 1, 128>}, {pipeline_mode = #tpu.pipeline_mode<synchronous>, transform_indices = @transform_4, window_bounds = array<i64: 1, 128>}, {transform_indices = @transform_5, window_bounds = array<i64: 1, 128, 128>}, {transform_indices = @transform_6, window_bounds = array<i64: 1, 1, 128>}, {transform_indices = @transform_7, window_bounds = array<i64: 1, 32, 128>}, {transform_indices = @transform_8, window_bounds = array<i64: 1, 1, 128>}, {transform_indices = @transform_9, window_bounds = array<i64: 1, 1, 128>}, {transform_indices = @transform_10, window_bounds = array<i64: 1, 1, 128>}, {transform_indices = @transform_11, window_bounds = array<i64: 1, 128, 128>}, {transform_indices = @transform_12, window_bounds = array<i64: 1, 1, 128>}, {transform_indices = @transform_13, window_bounds = array<i64: 1, 128, 128>}, {transform_indices = @transform_14, window_bounds = array<i64: 1, 1, 128>}, {transform_indices = @transform_15, window_bounds = array<i64: 1, 1, 128>}, {transform_indices = @transform_16, window_bounds = array<i64: 1, 1, 128>}, {pipeline_mode = #tpu.pipeline_mode<synchronous>, transform_indices = @transform_17, window_bounds = array<i64: 16, 128>}]} {
    %0 = tpu.iota {dimensions = array<i32: 1>} : vector<1x128xi32>
    %c32_i32 = arith.constant 32 : i32
    %1 = vector.broadcast %c32_i32 : i32 to vector<1x128xi32>
    %2 = arith.cmpi slt, %0, %1 : vector<1x128xi32>
    %c0_i32 = arith.constant 0 : i32
    %3 = arith.cmpi eq, %arg0, %c0_i32 : i32
    %4 = arith.extui %3 : i1 to i32
    %c0_i32_0 = arith.constant 0 : i32
    %5 = arith.cmpi ne, %4, %c0_i32_0 : i32
    scf.if %5 {
      %c0_82 = arith.constant 0 : index
      %c0_83 = arith.constant 0 : index
      %188 = vector.load %arg1[%c0_82, %c0_83] : memref<16x128xf32, #tpu.memory_space<vmem>>, vector<16x128xf32>
      %c0_84 = arith.constant 0 : index
      %c0_85 = arith.constant 0 : index
      %189 = vector.load %arg4[%c0_84, %c0_85] : memref<1x128xf32, #tpu.memory_space<vmem>>, vector<1x128xf32>
      %c0_86 = arith.constant 0 : index
      %c0_87 = arith.constant 0 : index
      %190 = vector.load %arg5[%c0_86, %c0_87] : memref<1x128xf32, #tpu.memory_space<vmem>>, vector<1x128xf32>
      %cst_88 = arith.constant dense<0.000000e+00> : vector<16xf32>
      %191 = vector.multi_reduction <add>, %188, %cst_88 [1] : vector<16x128xf32> to vector<16xf32>
      %192 = vector.shape_cast %191 : vector<16xf32> to vector<16x1xf32>
      %cst_89 = arith.constant 3.125000e-02 : f32
      %193 = vector.broadcast %cst_89 : f32 to vector<16x1xf32>
      %194 = arith.mulf %192, %193 : vector<16x1xf32>
      %195 = vector.broadcast %194 : vector<16x1xf32> to vector<16x128xf32>
      %196 = arith.subf %188, %195 : vector<16x128xf32>
      %cst_90 = arith.constant 0.000000e+00 : f32
      %197 = vector.shape_cast %2 : vector<1x128xi1> to vector<1x128xi1>
      %198 = vector.broadcast %197 : vector<1x128xi1> to vector<16x128xi1>
      %199 = vector.broadcast %cst_90 : f32 to vector<16x128xf32>
      %200 = arith.select %198, %196, %199 : vector<16x128xi1>, vector<16x128xf32>
      %201 = arith.mulf %200, %200 : vector<16x128xf32>
      %cst_91 = arith.constant dense<0.000000e+00> : vector<16xf32>
      %202 = vector.multi_reduction <add>, %201, %cst_91 [1] : vector<16x128xf32> to vector<16xf32>
      %203 = vector.shape_cast %202 : vector<16xf32> to vector<16x1xf32>
      %cst_92 = arith.constant 3.125000e-02 : f32
      %204 = vector.broadcast %cst_92 : f32 to vector<16x1xf32>
      %205 = arith.mulf %203, %204 : vector<16x1xf32>
      %cst_93 = arith.constant 9.99999996E-13 : f32
      %206 = vector.broadcast %cst_93 : f32 to vector<16x1xf32>
      %207 = arith.addf %205, %206 : vector<16x1xf32>
      %208 = math.rsqrt %207 : vector<16x1xf32>
      %209 = vector.broadcast %208 : vector<16x1xf32> to vector<16x128xf32>
      %210 = arith.mulf %200, %209 : vector<16x128xf32>
      %211 = vector.broadcast %189 : vector<1x128xf32> to vector<16x128xf32>
      %212 = arith.mulf %210, %211 : vector<16x128xf32>
      %213 = vector.broadcast %190 : vector<1x128xf32> to vector<16x128xf32>
      %214 = arith.addf %212, %213 : vector<16x128xf32>
      %c0_94 = arith.constant 0 : index
      %c0_95 = arith.constant 0 : index
      %215 = vector.load %arg19[%c0_94, %c0_95] : memref<16x128xf32, #tpu.memory_space<vmem>>, vector<16x128xf32>
      tpu.vector_store %arg19[%c0_94, %c0_95], %214 {strides = array<i32>} : memref<16x128xf32, #tpu.memory_space<vmem>>, vector<16x128xf32>,
    } else {
    }
    %c0 = arith.constant 0 : index
    %c0_1 = arith.constant 0 : index
    %6 = vector.load %arg19[%c0, %c0_1] : memref<16x128xf32, #tpu.memory_space<vmem>>, vector<16x128xf32>
    %c0_2 = arith.constant 0 : index
    %c0_3 = arith.constant 0 : index
    %7 = vector.load %arg2[%c0_2, %c0_3] : memref<16x16xf32, #tpu.memory_space<vmem>>, vector<16x16xf32>
    %8 = arith.truncf %6 : vector<16x128xf32> to vector<16x128xbf16>
    %c0_4 = arith.constant 0 : index
    %c0_5 = arith.constant 0 : index
    %c0_6 = arith.constant 0 : index
    %9 = vector.load %arg6[%c0_4, %c0_5, %c0_6] : memref<1x128x128xbf16, #tpu.memory_space<vmem>>, vector<1x128x128xbf16>
    %10 = vector.shape_cast %9 : vector<1x128x128xbf16> to vector<128x128xbf16>
    %cst = arith.constant dense<0.000000e+00> : vector<16x128xf32>
    %11 = tpu.matmul %8, %10, %cst {dimension_numbers = #tpu.dot_dimension_numbers<[1], [0], [0], [1], [0, 0, 1, 1], [], []>} : vector<16x128xbf16>, vector<128x128xbf16>, vector<16x128xf32> -> vector<16x128xf32>
    %c0_7 = arith.constant 0 : index
    %c0_8 = arith.constant 0 : index
    %c0_9 = arith.constant 0 : index
    %12 = vector.load %arg7[%c0_7, %c0_8, %c0_9] : memref<1x1x128xf32, #tpu.memory_space<vmem>>, vector<1x1x128xf32>
    %13 = vector.shape_cast %12 : vector<1x1x128xf32> to vector<1x128xf32>
    %14 = vector.broadcast %13 : vector<1x128xf32> to vector<16x128xf32>
    %15 = arith.addf %11, %14 : vector<16x128xf32>
    %16 = vector.extract_strided_slice %15 {offsets = [0, 0], sizes = [16, 8], strides = [1, 1]} : vector<16x128xf32> to vector<16x8xf32>
    %17 = vector.extract_strided_slice %15 {offsets = [0, 32], sizes = [16, 8], strides = [1, 1]} : vector<16x128xf32> to vector<16x8xf32>
    %18 = vector.extract_strided_slice %15 {offsets = [0, 64], sizes = [16, 8], strides = [1, 1]} : vector<16x128xf32> to vector<16x8xf32>
    %cst_10 = arith.constant dense<0.000000e+00> : vector<16x16xf32>
    %19 = tpu.matmul %16, %17, %cst_10 {dimension_numbers = #tpu.dot_dimension_numbers<[1], [1], [0], [0], [0, 0, 1, 0], [], []>} : vector<16x8xf32>, vector<16x8xf32>, vector<16x16xf32> -> vector<16x16xf32>
    %cst_11 = arith.constant 0.353553385 : f32
    %20 = vector.broadcast %cst_11 : f32 to vector<16x16xf32>
    %21 = arith.mulf %19, %20 : vector<16x16xf32>
    %22 = arith.addf %21, %7 : vector<16x16xf32>
    %cst_12 = arith.constant dense<0xFF800000> : vector<16xf32>
    %23 = vector.multi_reduction <maximumf>, %22, %cst_12 [1] : vector<16x16xf32> to vector<16xf32>
    %24 = vector.shape_cast %23 : vector<16xf32> to vector<16x1xf32>
    %25 = vector.broadcast %24 : vector<16x1xf32> to vector<16x16xf32>
    %26 = arith.subf %22, %25 : vector<16x16xf32>
    %27 = math.exp %26 : vector<16x16xf32>
    %cst_13 = arith.constant dense<0.000000e+00> : vector<16xf32>
    %28 = vector.multi_reduction <add>, %27, %cst_13 [1] : vector<16x16xf32> to vector<16xf32>
    %29 = vector.shape_cast %28 : vector<16xf32> to vector<16x1xf32>
    %30 = tpu.reciprocal %29 {approx = true} : vector<16x1xf32> -> vector<16x1xf32>
    %31 = vector.broadcast %30 : vector<16x1xf32> to vector<16x16xf32>
    %32 = arith.mulf %27, %31 : vector<16x16xf32>
    %cst_14 = arith.constant dense<0.000000e+00> : vector<16x8xf32>
    %33 = tpu.matmul %32, %18, %cst_14 {dimension_numbers = #tpu.dot_dimension_numbers<[1], [0], [0], [1], [0, 0, 1, 1], [], []>} : vector<16x16xf32>, vector<16x8xf32>, vector<16x8xf32> -> vector<16x8xf32>
    %34 = vector.extract_strided_slice %15 {offsets = [0, 8], sizes = [16, 8], strides = [1, 1]} : vector<16x128xf32> to vector<16x8xf32>
    %35 = vector.extract_strided_slice %15 {offsets = [0, 40], sizes = [16, 8], strides = [1, 1]} : vector<16x128xf32> to vector<16x8xf32>
    %36 = vector.extract_strided_slice %15 {offsets = [0, 72], sizes = [16, 8], strides = [1, 1]} : vector<16x128xf32> to vector<16x8xf32>
    %cst_15 = arith.constant dense<0.000000e+00> : vector<16x16xf32>
    %37 = tpu.matmul %34, %35, %cst_15 {dimension_numbers = #tpu.dot_dimension_numbers<[1], [1], [0], [0], [0, 0, 1, 0], [], []>} : vector<16x8xf32>, vector<16x8xf32>, vector<16x16xf32> -> vector<16x16xf32>
    %cst_16 = arith.constant 0.353553385 : f32
    %38 = vector.broadcast %cst_16 : f32 to vector<16x16xf32>
    %39 = arith.mulf %37, %38 : vector<16x16xf32>
    %40 = arith.addf %39, %7 : vector<16x16xf32>
    %cst_17 = arith.constant dense<0xFF800000> : vector<16xf32>
    %41 = vector.multi_reduction <maximumf>, %40, %cst_17 [1] : vector<16x16xf32> to vector<16xf32>
    %42 = vector.shape_cast %41 : vector<16xf32> to vector<16x1xf32>
    %43 = vector.broadcast %42 : vector<16x1xf32> to vector<16x16xf32>
    %44 = arith.subf %40, %43 : vector<16x16xf32>
    %45 = math.exp %44 : vector<16x16xf32>
    %cst_18 = arith.constant dense<0.000000e+00> : vector<16xf32>
    %46 = vector.multi_reduction <add>, %45, %cst_18 [1] : vector<16x16xf32> to vector<16xf32>
    %47 = vector.shape_cast %46 : vector<16xf32> to vector<16x1xf32>
    %48 = tpu.reciprocal %47 {approx = true} : vector<16x1xf32> -> vector<16x1xf32>
    %49 = vector.broadcast %48 : vector<16x1xf32> to vector<16x16xf32>
    %50 = arith.mulf %45, %49 : vector<16x16xf32>
    %cst_19 = arith.constant dense<0.000000e+00> : vector<16x8xf32>
    %51 = tpu.matmul %50, %36, %cst_19 {dimension_numbers = #tpu.dot_dimension_numbers<[1], [0], [0], [1], [0, 0, 1, 1], [], []>} : vector<16x16xf32>, vector<16x8xf32>, vector<16x8xf32> -> vector<16x8xf32>
    %52 = vector.extract_strided_slice %15 {offsets = [0, 16], sizes = [16, 8], strides = [1, 1]} : vector<16x128xf32> to vector<16x8xf32>
    %53 = vector.extract_strided_slice %15 {offsets = [0, 48], sizes = [16, 8], strides = [1, 1]} : vector<16x128xf32> to vector<16x8xf32>
    %54 = vector.extract_strided_slice %15 {offsets = [0, 80], sizes = [16, 8], strides = [1, 1]} : vector<16x128xf32> to vector<16x8xf32>
    %cst_20 = arith.constant dense<0.000000e+00> : vector<16x16xf32>
    %55 = tpu.matmul %52, %53, %cst_20 {dimension_numbers = #tpu.dot_dimension_numbers<[1], [1], [0], [0], [0, 0, 1, 0], [], []>} : vector<16x8xf32>, vector<16x8xf32>, vector<16x16xf32> -> vector<16x16xf32>
    %cst_21 = arith.constant 0.353553385 : f32
    %56 = vector.broadcast %cst_21 : f32 to vector<16x16xf32>
    %57 = arith.mulf %55, %56 : vector<16x16xf32>
    %58 = arith.addf %57, %7 : vector<16x16xf32>
    %cst_22 = arith.constant dense<0xFF800000> : vector<16xf32>
    %59 = vector.multi_reduction <maximumf>, %58, %cst_22 [1] : vector<16x16xf32> to vector<16xf32>
    %60 = vector.shape_cast %59 : vector<16xf32> to vector<16x1xf32>
    %61 = vector.broadcast %60 : vector<16x1xf32> to vector<16x16xf32>
    %62 = arith.subf %58, %61 : vector<16x16xf32>
    %63 = math.exp %62 : vector<16x16xf32>
    %cst_23 = arith.constant dense<0.000000e+00> : vector<16xf32>
    %64 = vector.multi_reduction <add>, %63, %cst_23 [1] : vector<16x16xf32> to vector<16xf32>
    %65 = vector.shape_cast %64 : vector<16xf32> to vector<16x1xf32>
    %66 = tpu.reciprocal %65 {approx = true} : vector<16x1xf32> -> vector<16x1xf32>
    %67 = vector.broadcast %66 : vector<16x1xf32> to vector<16x16xf32>
    %68 = arith.mulf %63, %67 : vector<16x16xf32>
    %cst_24 = arith.constant dense<0.000000e+00> : vector<16x8xf32>
    %69 = tpu.matmul %68, %54, %cst_24 {dimension_numbers = #tpu.dot_dimension_numbers<[1], [0], [0], [1], [0, 0, 1, 1], [], []>} : vector<16x16xf32>, vector<16x8xf32>, vector<16x8xf32> -> vector<16x8xf32>
    %70 = vector.extract_strided_slice %15 {offsets = [0, 24], sizes = [16, 8], strides = [1, 1]} : vector<16x128xf32> to vector<16x8xf32>
    %71 = vector.extract_strided_slice %15 {offsets = [0, 56], sizes = [16, 8], strides = [1, 1]} : vector<16x128xf32> to vector<16x8xf32>
    %72 = vector.extract_strided_slice %15 {offsets = [0, 88], sizes = [16, 8], strides = [1, 1]} : vector<16x128xf32> to vector<16x8xf32>
    %cst_25 = arith.constant dense<0.000000e+00> : vector<16x16xf32>
    %73 = tpu.matmul %70, %71, %cst_25 {dimension_numbers = #tpu.dot_dimension_numbers<[1], [1], [0], [0], [0, 0, 1, 0], [], []>} : vector<16x8xf32>, vector<16x8xf32>, vector<16x16xf32> -> vector<16x16xf32>
    %cst_26 = arith.constant 0.353553385 : f32
    %74 = vector.broadcast %cst_26 : f32 to vector<16x16xf32>
    %75 = arith.mulf %73, %74 : vector<16x16xf32>
    %76 = arith.addf %75, %7 : vector<16x16xf32>
    %cst_27 = arith.constant dense<0xFF800000> : vector<16xf32>
    %77 = vector.multi_reduction <maximumf>, %76, %cst_27 [1] : vector<16x16xf32> to vector<16xf32>
    %78 = vector.shape_cast %77 : vector<16xf32> to vector<16x1xf32>
    %79 = vector.broadcast %78 : vector<16x1xf32> to vector<16x16xf32>
    %80 = arith.subf %76, %79 : vector<16x16xf32>
    %81 = math.exp %80 : vector<16x16xf32>
    %cst_28 = arith.constant dense<0.000000e+00> : vector<16xf32>
    %82 = vector.multi_reduction <add>, %81, %cst_28 [1] : vector<16x16xf32> to vector<16xf32>
    %83 = vector.shape_cast %82 : vector<16xf32> to vector<16x1xf32>
    %84 = tpu.reciprocal %83 {approx = true} : vector<16x1xf32> -> vector<16x1xf32>
    %85 = vector.broadcast %84 : vector<16x1xf32> to vector<16x16xf32>
    %86 = arith.mulf %81, %85 : vector<16x16xf32>
    %cst_29 = arith.constant dense<0.000000e+00> : vector<16x8xf32>
    %87 = tpu.matmul %86, %72, %cst_29 {dimension_numbers = #tpu.dot_dimension_numbers<[1], [0], [0], [1], [0, 0, 1, 1], [], []>} : vector<16x16xf32>, vector<16x8xf32>, vector<16x8xf32> -> vector<16x8xf32>
    %88 = tpu.concatenate %33, %51, %69, %87 in 1 : vector<16x8xf32>, vector<16x8xf32>, vector<16x8xf32>, vector<16x8xf32> -> vector<16x32xf32>
    %89 = arith.truncf %88 : vector<16x32xf32> to vector<16x32xbf16>
    %c0_30 = arith.constant 0 : index
    %c0_31 = arith.constant 0 : index
    %c0_32 = arith.constant 0 : index
    %90 = vector.load %arg8[%c0_30, %c0_31, %c0_32] : memref<1x32x128xbf16, #tpu.memory_space<vmem>>, vector<1x32x128xbf16>
    %91 = vector.shape_cast %90 : vector<1x32x128xbf16> to vector<32x128xbf16>
    %cst_33 = arith.constant dense<0.000000e+00> : vector<16x128xf32>
    %92 = tpu.matmul %89, %91, %cst_33 {dimension_numbers = #tpu.dot_dimension_numbers<[1], [0], [0], [1], [0, 0, 1, 1], [], []>} : vector<16x32xbf16>, vector<32x128xbf16>, vector<16x128xf32> -> vector<16x128xf32>
    %c0_34 = arith.constant 0 : index
    %c0_35 = arith.constant 0 : index
    %c0_36 = arith.constant 0 : index
    %93 = vector.load %arg9[%c0_34, %c0_35, %c0_36] : memref<1x1x128xf32, #tpu.memory_space<vmem>>, vector<1x1x128xf32>
    %94 = vector.shape_cast %93 : vector<1x1x128xf32> to vector<1x128xf32>
    %95 = vector.broadcast %94 : vector<1x128xf32> to vector<16x128xf32>
    %96 = arith.addf %92, %95 : vector<16x128xf32>
    %97 = arith.addf %6, %96 : vector<16x128xf32>
    %c0_37 = arith.constant 0 : index
    %c0_38 = arith.constant 0 : index
    %c0_39 = arith.constant 0 : index
    %98 = vector.load %arg10[%c0_37, %c0_38, %c0_39] : memref<1x1x128xf32, #tpu.memory_space<vmem>>, vector<1x1x128xf32>
    %99 = vector.shape_cast %98 : vector<1x1x128xf32> to vector<1x128xf32>
    %c0_40 = arith.constant 0 : index
    %c0_41 = arith.constant 0 : index
    %c0_42 = arith.constant 0 : index
    %100 = vector.load %arg11[%c0_40, %c0_41, %c0_42] : memref<1x1x128xf32, #tpu.memory_space<vmem>>, vector<1x1x128xf32>
    %101 = vector.shape_cast %100 : vector<1x1x128xf32> to vector<1x128xf32>
    %cst_43 = arith.constant dense<0.000000e+00> : vector<16xf32>
    %102 = vector.multi_reduction <add>, %97, %cst_43 [1] : vector<16x128xf32> to vector<16xf32>
    %103 = vector.shape_cast %102 : vector<16xf32> to vector<16x1xf32>
    %cst_44 = arith.constant 3.125000e-02 : f32
    %104 = vector.broadcast %cst_44 : f32 to vector<16x1xf32>
    %105 = arith.mulf %103, %104 : vector<16x1xf32>
    %106 = vector.broadcast %105 : vector<16x1xf32> to vector<16x128xf32>
    %107 = arith.subf %97, %106 : vector<16x128xf32>
    %cst_45 = arith.constant 0.000000e+00 : f32
    %108 = vector.shape_cast %2 : vector<1x128xi1> to vector<1x128xi1>
    %109 = vector.broadcast %108 : vector<1x128xi1> to vector<16x128xi1>
    %110 = vector.broadcast %cst_45 : f32 to vector<16x128xf32>
    %111 = arith.select %109, %107, %110 : vector<16x128xi1>, vector<16x128xf32>
    %112 = arith.mulf %111, %111 : vector<16x128xf32>
    %cst_46 = arith.constant dense<0.000000e+00> : vector<16xf32>
    %113 = vector.multi_reduction <add>, %112, %cst_46 [1] : vector<16x128xf32> to vector<16xf32>
    %114 = vector.shape_cast %113 : vector<16xf32> to vector<16x1xf32>
    %cst_47 = arith.constant 3.125000e-02 : f32
    %115 = vector.broadcast %cst_47 : f32 to vector<16x1xf32>
    %116 = arith.mulf %114, %115 : vector<16x1xf32>
    %cst_48 = arith.constant 9.99999996E-13 : f32
    %117 = vector.broadcast %cst_48 : f32 to vector<16x1xf32>
    %118 = arith.addf %116, %117 : vector<16x1xf32>
    %119 = math.rsqrt %118 : vector<16x1xf32>
    %120 = vector.broadcast %119 : vector<16x1xf32> to vector<16x128xf32>
    %121 = arith.mulf %111, %120 : vector<16x128xf32>
    %122 = vector.broadcast %99 : vector<1x128xf32> to vector<16x128xf32>
    %123 = arith.mulf %121, %122 : vector<16x128xf32>
    %124 = vector.broadcast %101 : vector<1x128xf32> to vector<16x128xf32>
    %125 = arith.addf %123, %124 : vector<16x128xf32>
    %126 = arith.truncf %125 : vector<16x128xf32> to vector<16x128xbf16>
    %c0_49 = arith.constant 0 : index
    %c0_50 = arith.constant 0 : index
    %c0_51 = arith.constant 0 : index
    %127 = vector.load %arg12[%c0_49, %c0_50, %c0_51] : memref<1x128x128xbf16, #tpu.memory_space<vmem>>, vector<1x128x128xbf16>
    %128 = vector.shape_cast %127 : vector<1x128x128xbf16> to vector<128x128xbf16>
    %cst_52 = arith.constant dense<0.000000e+00> : vector<16x128xf32>
    %129 = tpu.matmul %126, %128, %cst_52 {dimension_numbers = #tpu.dot_dimension_numbers<[1], [0], [0], [1], [0, 0, 1, 1], [], []>} : vector<16x128xbf16>, vector<128x128xbf16>, vector<16x128xf32> -> vector<16x128xf32>
    %c0_53 = arith.constant 0 : index
    %c0_54 = arith.constant 0 : index
    %c0_55 = arith.constant 0 : index
    %130 = vector.load %arg13[%c0_53, %c0_54, %c0_55] : memref<1x1x128xf32, #tpu.memory_space<vmem>>, vector<1x1x128xf32>
    %131 = vector.shape_cast %130 : vector<1x1x128xf32> to vector<1x128xf32>
    %132 = vector.broadcast %131 : vector<1x128xf32> to vector<16x128xf32>
    %133 = arith.addf %129, %132 : vector<16x128xf32>
    %134 = arith.mulf %133, %133 : vector<16x128xf32>
    %135 = arith.mulf %133, %134 : vector<16x128xf32>
    %cst_56 = arith.constant 4.471500e-02 : f32
    %136 = vector.broadcast %cst_56 : f32 to vector<16x128xf32>
    %137 = arith.mulf %136, %135 : vector<16x128xf32>
    %138 = arith.addf %133, %137 : vector<16x128xf32>
    %cst_57 = arith.constant 0.797884583 : f32
    %139 = vector.broadcast %cst_57 : f32 to vector<16x128xf32>
    %140 = arith.mulf %139, %138 : vector<16x128xf32>
    %141 = math.tanh %140 : vector<16x128xf32>
    %cst_58 = arith.constant 1.000000e+00 : f32
    %142 = vector.broadcast %cst_58 : f32 to vector<16x128xf32>
    %143 = arith.addf %142, %141 : vector<16x128xf32>
    %cst_59 = arith.constant 5.000000e-01 : f32
    %144 = vector.broadcast %cst_59 : f32 to vector<16x128xf32>
    %145 = arith.mulf %144, %143 : vector<16x128xf32>
    %146 = arith.mulf %133, %145 : vector<16x128xf32>
    %147 = arith.truncf %146 : vector<16x128xf32> to vector<16x128xbf16>
    %c0_60 = arith.constant 0 : index
    %c0_61 = arith.constant 0 : index
    %c0_62 = arith.constant 0 : index
    %148 = vector.load %arg14[%c0_60, %c0_61, %c0_62] : memref<1x128x128xbf16, #tpu.memory_space<vmem>>, vector<1x128x128xbf16>
    %149 = vector.shape_cast %148 : vector<1x128x128xbf16> to vector<128x128xbf16>
    %cst_63 = arith.constant dense<0.000000e+00> : vector<16x128xf32>
    %150 = tpu.matmul %147, %149, %cst_63 {dimension_numbers = #tpu.dot_dimension_numbers<[1], [0], [0], [1], [0, 0, 1, 1], [], []>} : vector<16x128xbf16>, vector<128x128xbf16>, vector<16x128xf32> -> vector<16x128xf32>
    %c0_64 = arith.constant 0 : index
    %c0_65 = arith.constant 0 : index
    %c0_66 = arith.constant 0 : index
    %151 = vector.load %arg15[%c0_64, %c0_65, %c0_66] : memref<1x1x128xf32, #tpu.memory_space<vmem>>, vector<1x1x128xf32>
    %152 = vector.shape_cast %151 : vector<1x1x128xf32> to vector<1x128xf32>
    %153 = vector.broadcast %152 : vector<1x128xf32> to vector<16x128xf32>
    %154 = arith.addf %150, %153 : vector<16x128xf32>
    %155 = arith.addf %125, %154 : vector<16x128xf32>
    %c0_67 = arith.constant 0 : index
    %c0_68 = arith.constant 0 : index
    %c0_69 = arith.constant 0 : index
    %156 = vector.load %arg16[%c0_67, %c0_68, %c0_69] : memref<1x1x128xf32, #tpu.memory_space<vmem>>, vector<1x1x128xf32>
    %157 = vector.shape_cast %156 : vector<1x1x128xf32> to vector<1x128xf32>
    %c0_70 = arith.constant 0 : index
    %c0_71 = arith.constant 0 : index
    %c0_72 = arith.constant 0 : index
    %158 = vector.load %arg17[%c0_70, %c0_71, %c0_72] : memref<1x1x128xf32, #tpu.memory_space<vmem>>, vector<1x1x128xf32>
    %159 = vector.shape_cast %158 : vector<1x1x128xf32> to vector<1x128xf32>
    %cst_73 = arith.constant dense<0.000000e+00> : vector<16xf32>
    %160 = vector.multi_reduction <add>, %155, %cst_73 [1] : vector<16x128xf32> to vector<16xf32>
    %161 = vector.shape_cast %160 : vector<16xf32> to vector<16x1xf32>
    %cst_74 = arith.constant 3.125000e-02 : f32
    %162 = vector.broadcast %cst_74 : f32 to vector<16x1xf32>
    %163 = arith.mulf %161, %162 : vector<16x1xf32>
    %164 = vector.broadcast %163 : vector<16x1xf32> to vector<16x128xf32>
    %165 = arith.subf %155, %164 : vector<16x128xf32>
    %cst_75 = arith.constant 0.000000e+00 : f32
    %166 = vector.shape_cast %2 : vector<1x128xi1> to vector<1x128xi1>
    %167 = vector.broadcast %166 : vector<1x128xi1> to vector<16x128xi1>
    %168 = vector.broadcast %cst_75 : f32 to vector<16x128xf32>
    %169 = arith.select %167, %165, %168 : vector<16x128xi1>, vector<16x128xf32>
    %170 = arith.mulf %169, %169 : vector<16x128xf32>
    %cst_76 = arith.constant dense<0.000000e+00> : vector<16xf32>
    %171 = vector.multi_reduction <add>, %170, %cst_76 [1] : vector<16x128xf32> to vector<16xf32>
    %172 = vector.shape_cast %171 : vector<16xf32> to vector<16x1xf32>
    %cst_77 = arith.constant 3.125000e-02 : f32
    %173 = vector.broadcast %cst_77 : f32 to vector<16x1xf32>
    %174 = arith.mulf %172, %173 : vector<16x1xf32>
    %cst_78 = arith.constant 9.99999996E-13 : f32
    %175 = vector.broadcast %cst_78 : f32 to vector<16x1xf32>
    %176 = arith.addf %174, %175 : vector<16x1xf32>
    %177 = math.rsqrt %176 : vector<16x1xf32>
    %178 = vector.broadcast %177 : vector<16x1xf32> to vector<16x128xf32>
    %179 = arith.mulf %169, %178 : vector<16x128xf32>
    %180 = vector.broadcast %157 : vector<1x128xf32> to vector<16x128xf32>
    %181 = arith.mulf %179, %180 : vector<16x128xf32>
    %182 = vector.broadcast %159 : vector<1x128xf32> to vector<16x128xf32>
    %183 = arith.addf %181, %182 : vector<16x128xf32>
    %c0_79 = arith.constant 0 : index
    %c0_80 = arith.constant 0 : index
    %184 = vector.load %arg19[%c0_79, %c0_80] : memref<16x128xf32, #tpu.memory_space<vmem>>, vector<16x128xf32>
    tpu.vector_store %arg19[%c0_79, %c0_80], %183 {strides = array<i32>} : memref<16x128xf32, #tpu.memory_space<vmem>>, vector<16x128xf32>,
    %c1_i32 = arith.constant 1 : i32
    %185 = arith.cmpi eq, %arg0, %c1_i32 : i32
    %186 = arith.extui %185 : i1 to i32
    %c0_i32_81 = arith.constant 0 : i32
    %187 = arith.cmpi ne, %186, %c0_i32_81 : i32
    scf.if %187 {
      %c0_82 = arith.constant 0 : index
      %c0_83 = arith.constant 0 : index
      %188 = vector.load %arg3[%c0_82, %c0_83] : memref<16x16xf32, #tpu.memory_space<vmem>>, vector<16x16xf32>
      %c0_84 = arith.constant 0 : index
      %c0_85 = arith.constant 0 : index
      %189 = vector.load %arg19[%c0_84, %c0_85] : memref<16x128xf32, #tpu.memory_space<vmem>>, vector<16x128xf32>
      %cst_86 = arith.constant dense<0.000000e+00> : vector<16x128xf32>
      %190 = tpu.matmul %188, %189, %cst_86 {dimension_numbers = #tpu.dot_dimension_numbers<[1], [0], [0], [1], [0, 0, 1, 1], [], []>} : vector<16x16xf32>, vector<16x128xf32>, vector<16x128xf32> -> vector<16x128xf32>
      %c0_87 = arith.constant 0 : index
      %c0_88 = arith.constant 0 : index
      %191 = vector.load %arg18[%c0_87, %c0_88] : memref<16x128xf32, #tpu.memory_space<vmem>>, vector<16x128xf32>
      tpu.vector_store %arg18[%c0_87, %c0_88], %190 {strides = array<i32>} : memref<16x128xf32, #tpu.memory_space<vmem>>, vector<16x128xf32>,
    } else {
    }
    return
  }
  func.func @transform_0(%arg0: i32) -> (i32, i32) {
    %c0_i32 = arith.constant 0 : i32
    %c0_i32_0 = arith.constant 0 : i32
    %c0_i32_1 = arith.constant 0 : i32
    return %c0_i32, %c0_i32_0 : i32, i32
  }
  func.func @transform_1(%arg0: i32) -> (i32, i32) {
    %c0_i32 = arith.constant 0 : i32
    %c0_i32_0 = arith.constant 0 : i32
    %c0_i32_1 = arith.constant 0 : i32
    return %c0_i32, %c0_i32_0 : i32, i32
  }
  func.func @transform_2(%arg0: i32) -> (i32, i32) {
    %c0_i32 = arith.constant 0 : i32
    %c0_i32_0 = arith.constant 0 : i32
    %c0_i32_1 = arith.constant 0 : i32
    return %c0_i32, %c0_i32_0 : i32, i32
  }
  func.func @transform_3(%arg0: i32) -> (i32, i32) {
    %c0_i32 = arith.constant 0 : i32
    %c0_i32_0 = arith.constant 0 : i32
    %c0_i32_1 = arith.constant 0 : i32
    return %c0_i32, %c0_i32_0 : i32, i32
  }
  func.func @transform_4(%arg0: i32) -> (i32, i32) {
    %c0_i32 = arith.constant 0 : i32
    %c0_i32_0 = arith.constant 0 : i32
    %c0_i32_1 = arith.constant 0 : i32
    return %c0_i32, %c0_i32_0 : i32, i32
  }
  func.func @transform_5(%arg0: i32) -> (i32, i32, i32) {
    %c0_i32 = arith.constant 0 : i32
    %c0_i32_0 = arith.constant 0 : i32
    %c0_i32_1 = arith.constant 0 : i32
    return %arg0, %c0_i32, %c0_i32_0 : i32, i32, i32
  }
  func.func @transform_6(%arg0: i32) -> (i32, i32, i32) {
    %c0_i32 = arith.constant 0 : i32
    %c0_i32_0 = arith.constant 0 : i32
    %c0_i32_1 = arith.constant 0 : i32
    return %arg0, %c0_i32, %c0_i32_0 : i32, i32, i32
  }
  func.func @transform_7(%arg0: i32) -> (i32, i32, i32) {
    %c0_i32 = arith.constant 0 : i32
    %c0_i32_0 = arith.constant 0 : i32
    %c0_i32_1 = arith.constant 0 : i32
    return %arg0, %c0_i32, %c0_i32_0 : i32, i32, i32
  }
  func.func @transform_8(%arg0: i32) -> (i32, i32, i32) {
    %c0_i32 = arith.constant 0 : i32
    %c0_i32_0 = arith.constant 0 : i32
    %c0_i32_1 = arith.constant 0 : i32
    return %arg0, %c0_i32, %c0_i32_0 : i32, i32, i32
  }
  func.func @transform_9(%arg0: i32) -> (i32, i32, i32) {
    %c0_i32 = arith.constant 0 : i32
    %c0_i32_0 = arith.constant 0 : i32
    %c0_i32_1 = arith.constant 0 : i32
    return %arg0, %c0_i32, %c0_i32_0 : i32, i32, i32
  }
  func.func @transform_10(%arg0: i32) -> (i32, i32, i32) {
    %c0_i32 = arith.constant 0 : i32
    %c0_i32_0 = arith.constant 0 : i32
    %c0_i32_1 = arith.constant 0 : i32
    return %arg0, %c0_i32, %c0_i32_0 : i32, i32, i32
  }
  func.func @transform_11(%arg0: i32) -> (i32, i32, i32) {
    %c0_i32 = arith.constant 0 : i32
    %c0_i32_0 = arith.constant 0 : i32
    %c0_i32_1 = arith.constant 0 : i32
    return %arg0, %c0_i32, %c0_i32_0 : i32, i32, i32
  }
  func.func @transform_12(%arg0: i32) -> (i32, i32, i32) {
    %c0_i32 = arith.constant 0 : i32
    %c0_i32_0 = arith.constant 0 : i32
    %c0_i32_1 = arith.constant 0 : i32
    return %arg0, %c0_i32, %c0_i32_0 : i32, i32, i32
  }
  func.func @transform_13(%arg0: i32) -> (i32, i32, i32) {
    %c0_i32 = arith.constant 0 : i32
    %c0_i32_0 = arith.constant 0 : i32
    %c0_i32_1 = arith.constant 0 : i32
    return %arg0, %c0_i32, %c0_i32_0 : i32, i32, i32
  }
  func.func @transform_14(%arg0: i32) -> (i32, i32, i32) {
    %c0_i32 = arith.constant 0 : i32
    %c0_i32_0 = arith.constant 0 : i32
    %c0_i32_1 = arith.constant 0 : i32
    return %arg0, %c0_i32, %c0_i32_0 : i32, i32, i32
  }
  func.func @transform_15(%arg0: i32) -> (i32, i32, i32) {
    %c0_i32 = arith.constant 0 : i32
    %c0_i32_0 = arith.constant 0 : i32
    %c0_i32_1 = arith.constant 0 : i32
    return %arg0, %c0_i32, %c0_i32_0 : i32, i32, i32
  }
  func.func @transform_16(%arg0: i32) -> (i32, i32, i32) {
    %c0_i32 = arith.constant 0 : i32
    %c0_i32_0 = arith.constant 0 : i32
    %c0_i32_1 = arith.constant 0 : i32
    return %arg0, %c0_i32, %c0_i32_0 : i32, i32, i32
  }
  func.func @transform_17(%arg0: i32) -> (i32, i32) {
    %c0_i32 = arith.constant 0 : i32
    %c0_i32_0 = arith.constant 0 : i32
    %c0_i32_1 = arith.constant 0 : i32
    return %c0_i32, %c0_i32_0 : i32, i32
  }
}

</mosaic_0001>

<bundles_post_ra>
// kernel: tpu_custom_call.1
= control target key start
LH: loop header
LB: loop body
LE: loop exit
PB: predicated region body
PF: predicated region fallthrough
CT: control target
= control target key end

     0   :  { %s4254_s0 = inlined_call_operand.hbm [shape: f32[16,128], index: 0, kind: input, shape index: {}]   ;;  %s4255_s1 = inlined_call_operand.hbm [shape: f32[16,16], index: 1, kind: input, shape index: {}]   ;;  %s4256_s2 = inlined_call_operand.hbm [shape: f32[16,16], index: 2, kind: input, shape index: {}]   ;;  %s4257_s3 = inlined_call_operand.vmem [shape: f32[1,128], index: 3, kind: input, shape index: {}]   ;;  %s4258_s4 = inlined_call_operand.hbm [shape: f32[1,128], index: 4, kind: input, shape index: {}]   ;;  %s4259_s5 = inlined_call_operand.hbm [shape: bf16[2,128,128], index: 5, kind: input, shape index: {}]   ;;  %s4260_s6 = inlined_call_operand.vmem [shape: f32[2,1,128], index: 6, kind: input, shape index: {}]   ;;  %s4261_s7 = inlined_call_operand.hbm [shape: bf16[2,32,128], index: 7, kind: input, shape index: {}]   ;;  %s4262_s8 = inlined_call_operand.vmem [shape: f32[2,1,128], index: 8, kind: input, shape index: {}]   ;;  %s4263_s9 = inlined_call_operand.vmem [shape: f32[2,1,128], index: 9, kind: input, shape index: {}]   ;;  %s4264_s10 = inlined_call_operand.vmem [shape: f32[2,1,128], index: 10, kind: input, shape index: {}]   ;;  %s4265_s11 = inlined_call_operand.hbm [shape: bf16[2,128,128], index: 11, kind: input, shape index: {}]   ;;  %s4266_s12 = inlined_call_operand.vmem [shape: f32[2,1,128], index: 12, kind: input, shape index: {}]   ;;  %s4267_s13 = inlined_call_operand.hbm [shape: bf16[2,128,128], index: 13, kind: input, shape index: {}]   ;;  %s4268_s14 = inlined_call_operand.vmem [shape: f32[2,1,128], index: 14, kind: input, shape index: {}]   ;;  %s4269_s15 = inlined_call_operand.vmem [shape: f32[2,1,128], index: 15, kind: input, shape index: {}]   ;;  %s4270_s16 = inlined_call_operand.vmem [shape: f32[2,1,128], index: 16, kind: input, shape index: {}]   ;;  %s4271_s17 = inlined_call_operand.hbm [shape: f32[16,128], index: 17, kind: output, shape index: {}]  }
   0x1   :  { %4297 = sst [smem:[#allocation24_spill]] %s4254_s0 }
   0x2   :  { %4298 = sst [smem:[#allocation25_spill]] %s4255_s1 }
   0x3   :  { %4299 = sst [smem:[#allocation26_spill]] %s4256_s2 }
   0x4   :  { %4300 = sst [smem:[#allocation27_spill]] %s4257_s3 }
   0x5   :  { %4301 = sst [smem:[#allocation28_spill]] %s4259_s5 }
   0x6   :  { %4302 = sst [smem:[#allocation29_spill]] %s4260_s6 }
   0x7   :  { %4303 = sst [smem:[#allocation30_spill]] %s4261_s7 }
   0x8   :  { %4304 = sst [smem:[#allocation31_spill]] %s4262_s8 }
   0x9   :  { %4305 = sst [smem:[#allocation32_spill]] %s4263_s9 }
   0xa   :  { %4306 = sst [smem:[#allocation33_spill]] %s4264_s10 }
   0xb   :  { %4307 = sst [smem:[#allocation34_spill]] %s4265_s11 }
   0xc   :  { %4308 = sst [smem:[#allocation35_spill]] %s4266_s12 }
   0xd   :  { %4309 = sst [smem:[#allocation36_spill]] %s4268_s14 }
   0xe   :  { %4310 = sst [smem:[#allocation37_spill]] %s4269_s15 }
   0xf   :  { %4311 = sst [smem:[#allocation38_spill]] %s4270_s16 }
  0x10   :  { %4312 = sst [smem:[#allocation39_spill]] %s4271_s17 }
  0x11   :  { %22 = vsyncpa [#allocation4], 0 }
  0x12   :  { %23 = vsyncpa [#allocation7], 0 }
  0x13   :  { %24 = vsyncpa [#allocation10], 0 }
  0x14   :  { %25 = vsyncpa [#allocation5], 0  ;;  %s3601_s24 = smov 0   ;;  %s3603_s25 = smov 0  }
  0x15   :  { %s3605_s26 = smov 0   ;;  %s3607_s27 = smov 0  }
  0x16 LB: > { %s3620_s28 = sadd.s32 4294967295, %s3479_s27   ;;  %p156_p0 = scmp.ne.s32.totalorder %s3471_s25, %s3467_s24  ;;  %s3479_s27 = sphi %s3607_s27, %s4371_s27   ;;  %s3475_s26 = sphi %s3605_s26, %s4375_s26   ;;  %s3471_s25 = sphi %s3603_s25, %s4374_s25   ;;  %s3467_s24 = sphi %s3601_s24, %s4373_s24  }
  0x17   : > { %p4275_p1 = scmp.eq.s32.totalorder %s3620_s28, 0  ;;  %p2578_p2 = scmp.ge.s32.totalorder %s3479_s27, 1 }
  0x18   : > { %p474_p3 = scmp.lt.s32.totalorder %s3479_s27, 3  ;;  %s3481_s30 = smov [#allocation3]  }
  0x19   : > { %p3629_p5 = por %p4275_p1, %p156_p0  ;;  %s486_s18 = sshll.u32 %s3481_s30, 4  ;;  %s487_s18 = int_to_ptr.vmem [resolvable:$true] %s486_s18 }
  0x1a   : > { %p3633_p6 = pnand %p2578_p2, %p474_p3  ;;  %s3646_s1 = sadd.s32 1, %s3479_s27  }
  0x1b   : > { %s4313_s29 = scalar_select %p3629_p5, 1, 0 }
  0x1c   : > { %s4315_s0 = scalar_select %p3633_p6, 1, 0 }
  0x1d   : > { %4314 = sst [smem:[#allocation21_spill]] %s4313_s29  ;;  %p2947_p7 = pneg %p3633_p6 }
  0x1e   : > { %4317 = sst [smem:[#allocation22_spill]] %s3646_s1  ;;  %s143_s20 = sadd.s32 1, %s3475_s26 }
  0x1f   : > { %p3641_p8 = pnand %p2947_p7, %p4275_p1  ;;  %s140_s21 = ssub.s32 %s3479_s27, %s3646_s1 }
  0x20   : > { %s4318_s24 = sld [smem:[#allocation24_spill]] }
  0x21   : > { %s4316_s19 = scalar_select %p3641_p8, 1, 0 }
  0x22   : > { %p3659_p10 = pneg %p3641_p8 }
  0x24   : > { %s4320_s15 = scalar_select %p3659_p10, 1, 0 }
  0x26   : > { %s4319_s17 = smov %s4318_s24  ;;  %s3171_s3 = scalar_lea.hbm %s4318_s24, 256 }
  0x27   : > { %p3172_p9 = scmp.ne.s32.totalorder %s4319_s17, %s3171_s3  ;;  %p3178_p13 = scmp.lt.u32.totalorder %s3171_s3, %s4319_s17 }
  0x29   : > { %p3174_p11 = pnand %p3659_p10, %p3172_p9 }
  0x2b   : > { %p3175_p12 = pneg %p3174_p11 }
  0x2d   : > { %p3180_p0 = pnand %p3178_p13, %p3175_p12 }
  0x2f   : > { %3183 = shalt.err (!%p3180_p0)
}
  0x30   : > { %s3184_s22 = scalar_lea.vmem %s487_s18, 256  ;;  %p3192_p4 = scmp.lt.s32.totalorder %s487_s18, %s487_s18 }
  0x31   : > { %p3185_p2 = scmp.ne.s32.totalorder %s487_s18, %s3184_s22  ;;  %p3193_p1 = scmp.lt.s32.totalorder %s3184_s22, %s3184_s22 }
  0x33   : > { %p3187_p3 = pnand %p3185_p2, %p3659_p10  ;;  %p3194_p5 = por %p3193_p1, %p3192_p4 }
  0x35   : > { %p3188_p7 = pneg %p3187_p3 }
  0x37   : > { %p3195_p6 = pnand %p3194_p5, %p3188_p7 }
  0x39   : > { %3198 = shalt.err (!%p3195_p6)
}
  0x3a   : > { %s4280_s16 = smov 128   ;;  %s4282_s3 = smov 8  }
  0x3b   : > { %2950 = dma.hbm_to_vmem [thread:$0]  (!%p3641_p8), %s4319_s17, 256, %s487_s18, [#allocation4], %s4280_s16, %s4280_s16, %s4282_s3  }
  0x3c   : > { %p141_p1 = scmp.eq.s32.totalorder %s140_s21, 0  ;;  %p150_p4 = scmp.ne.s32.totalorder %s3475_s26, %s3471_s25 }
  0x3d   : > { %p151_p5 = scmp.eq.s32.totalorder %s3479_s27, 0  ;;  %p2977_p6 = scmp.lt.s32.totalorder %s3479_s27, 2 }
  0x3e   : > { %s3683_s23 = scalar_select %p141_p1, %s3475_s26, %s143_s20  }
  0x3f   : > { %p152_p9 = por %p151_p5, %p150_p4  ;;  %s540_s24 = sand.u32 1, %s3479_s27  }
  0x40   : > { %4321 = sst [smem:[#allocation23_spill]] %s3683_s23  ;;  %s4284_s30 = sand.u32 1, %s3475_s26  }
  0x41   : > { %s3689_s22 = sshll.u32 %s4284_s30, 6  ;;  %s3692_s1 = sshll.u32 %s3479_s27, 10 }
  0x42   : > { %s4322_s5 = sld [smem:[#allocation28_spill]]  ;;  %s544_s20 = scalar_lea.vmem [#allocation11], %s3689_s22 }
  0x43   : > { %s551_s21 = sshll.u32 %s544_s20, 4  ;;  %p3701_p11 = pnand %p2977_p6, %p152_p9  ;;  %s3705_s21 = int_to_ptr.vmem [resolvable:$true] %s551_s21 }
  0x44   : > { %s3707_s14 = scalar_lea.sflag [#allocation4], %s540_s24 }
  0x45   : > { %s4323_s12 = scalar_select %p3701_p11, 1, 0 }
  0x46   : > { %p3713_p13 = pneg %p3701_p11 }
  0x48   : > { %s3698_s18 = scalar_lea.hbm %s4322_s5, %s3692_s1  ;;  %s3204_s3 = scalar_lea.hbm %s4322_s5, 2048 }
  0x49   : > { %s3199_s16 = scalar_lea.hbm %s3698_s18, 1024  ;;  %p3205_p3 = scmp.lt.u32.totalorder %s3698_s18, %s4322_s5 }
  0x4a   : > { %p3200_p12 = scmp.ne.s32.totalorder %s3698_s18, %s3199_s16  ;;  %p3206_p7 = scmp.lt.u32.totalorder %s3204_s3, %s3199_s16 }
  0x4b   : > { %s4324_s9 = scalar_select %p3713_p13, 1, 0 }
  0x4c   : > { %p3202_p0 = pnand %p3713_p13, %p3200_p12  ;;  %p3207_p1 = por %p3206_p7, %p3205_p3 }
  0x4d   : > { %p3208_p4 = scmp.lt.u32.totalorder %s3199_s16, %s3698_s18 }
  0x4e   : > { %p3203_p2 = pneg %p3202_p0 }
  0x4f   : > { %p3209_p5 = por %p3208_p4, %p3207_p1 }
  0x51   : > { %p3210_p6 = pnand %p3209_p5, %p3203_p2 }
  0x53   : > { %3213 = shalt.err (!%p3210_p6)
}
  0x54   : > { %s3214_s24 = scalar_lea.vmem %s3705_s21, 1024  ;;  %s3484_s10 = smov [#allocation11]  }
  0x55   : > { %p3215_p9 = scmp.ne.s32.totalorder %s3705_s21, %s3214_s24  ;;  %s3219_s20 = sshll.u32 %s3484_s10, 4  ;;  %s3220_s20 = int_to_ptr.vmem [resolvable:$false] %s3219_s20 }
  0x56   : > { %s3221_s17 = scalar_lea.vmem %s3220_s20, 2048  ;;  %p3222_p8 = scmp.lt.s32.totalorder %s3705_s21, %s3220_s20 }
  0x57   : > { %p3217_p12 = pnand %p3215_p9, %p3713_p13  ;;  %p3223_p10 = scmp.lt.s32.totalorder %s3221_s17, %s3214_s24 }
  0x59   : > { %p3218_p0 = pneg %p3217_p12  ;;  %p3224_p3 = por %p3223_p10, %p3222_p8 }
  0x5b   : > { %p3225_p7 = pnand %p3224_p3, %p3218_p0 }
  0x5d   : > { %3228 = shalt.err (!%p3225_p7)
}
  0x5e   : > { %s3485_s16 = smov 64   ;;  %s3486_s3 = smov 4  }
  0x5f   : > { %2963 = dma.hbm_to_vmem [thread:$0]  (!%p3701_p11), %s3698_s18, 1024, %s3705_s21, %s3707_s14, %s3485_s16, %s3485_s16, %s3486_s3  }
  0x60   : > { %s4325_s30 = sand.u32 1, %s3475_s26   ;;  %s2675_s24 = sshll.u32 %s3479_s27, 8 }
  0x61   : > { %s2587_s10 = sshll.u32 %s4325_s30, 4  ;;  %s4326_s7 = sld [smem:[#allocation30_spill]] }
  0x62   : > { %s571_s23 = scalar_lea.vmem [#allocation12], %s2587_s10  ;;  %s3487_s6 = smov [#allocation6]  }
  0x63   : > { %s578_s8 = sshll.u32 %s571_s23, 4  ;;  %s3750_s29 = sshll.u32 %s3487_s6, 4  ;;  %s3748_s8 = int_to_ptr.vmem [resolvable:$true] %s578_s8  ;;  %s500_s29 = int_to_ptr.vmem [resolvable:$true] %s3750_s29 }
  0x67   : > { %s3746_s5 = scalar_lea.hbm %s4326_s7, %s2675_s24  ;;  %s3234_s30 = scalar_lea.hbm %s4326_s7, 512 }
  0x68   : > { %s3229_s18 = scalar_lea.hbm %s3746_s5, 256  ;;  %p3235_p1 = scmp.lt.u32.totalorder %s3746_s5, %s4326_s7 }
  0x69   : > { %p3230_p8 = scmp.ne.s32.totalorder %s3746_s5, %s3229_s18  ;;  %p3236_p4 = scmp.lt.u32.totalorder %s3234_s30, %s3229_s18 }
  0x6a   : > { %p3238_p6 = scmp.lt.u32.totalorder %s3229_s18, %s3746_s5 }
  0x6b   : > { %p3232_p10 = pnand %p3230_p8, %p3713_p13  ;;  %p3237_p5 = por %p3236_p4, %p3235_p1 }
  0x6d   : > { %p3233_p2 = pneg %p3232_p10  ;;  %p3239_p9 = por %p3238_p6, %p3237_p5 }
  0x6f   : > { %p3240_p12 = pnand %p3239_p9, %p3233_p2 }
  0x71   : > { %3243 = shalt.err (!%p3240_p12)
}
  0x72   : > { %s3244_s6 = scalar_lea.vmem %s3748_s8, 256  ;;  %s3488_s23 = smov [#allocation12]  }
  0x73   : > { %p3245_p0 = scmp.ne.s32.totalorder %s3748_s8, %s3244_s6  ;;  %s3249_s10 = sshll.u32 %s3488_s23, 4  ;;  %s3250_s10 = int_to_ptr.vmem [resolvable:$false] %s3249_s10 }
  0x74   : > { %s3251_s17 = scalar_lea.vmem %s3250_s10, 512  ;;  %p3252_p8 = scmp.lt.s32.totalorder %s3748_s8, %s3250_s10 }
  0x75   : > { %p3247_p3 = pnand %p3245_p0, %p3713_p13  ;;  %p3253_p10 = scmp.lt.s32.totalorder %s3251_s17, %s3244_s6 }
  0x77   : > { %p3248_p7 = pneg %p3247_p3  ;;  %p3254_p1 = por %p3253_p10, %p3252_p8 }
  0x79   : > { %p3255_p4 = pnand %p3254_p1, %p3248_p7 }
  0x7b   : > { %3258 = shalt.err (!%p3255_p4)
}
  0x7c   : > { %2966 = dma.hbm_to_vmem [thread:$0]  (!%p3701_p11), %s3746_s5, 256, %s3748_s8, %s3707_s14, %s3485_s16, %s3485_s16, %s3486_s3  }
  0x7d   : > { %s4327_s21 = sld [smem:[#allocation25_spill]]  ;;  %p4328_p5 = scmp.ne.s32.totalorder %s4320_s15, 0 }
  0x83   : > { %s3259_s30 = scalar_lea.hbm %s4327_s21, 256 }
  0x84   : > { %p3260_p2 = scmp.ne.s32.totalorder %s4327_s21, %s3259_s30  ;;  %p3266_p12 = scmp.lt.u32.totalorder %s3259_s30, %s4327_s21 }
  0x86   : > { %p3262_p6 = pnand %p3260_p2, %p4328_p5 }
  0x88   : > { %p3263_p9 = pneg %p3262_p6 }
  0x8a   : > { %p3268_p0 = pnand %p3266_p12, %p3263_p9 }
  0x8c   : > { %3271 = shalt.err (!%p3268_p0)
}
  0x8d   : > { %s3272_s10 = scalar_lea.vmem %s500_s29, 256  ;;  %p3280_p10 = scmp.lt.s32.totalorder %s500_s29, %s500_s29 }
  0x8e   : > { %p3273_p3 = scmp.ne.s32.totalorder %s500_s29, %s3272_s10  ;;  %p3281_p1 = scmp.lt.s32.totalorder %s3272_s10, %s3272_s10 }
  0x90   : > { %p3275_p7 = pnand %p3273_p3, %p4328_p5  ;;  %p3282_p4 = por %p3281_p1, %p3280_p10 }
  0x92   : > { %p3276_p8 = pneg %p3275_p7 }
  0x94   : > { %p3283_p11 = pnand %p3282_p4, %p3276_p8 }
  0x96   : > { %3286 = shalt.err (!%p3283_p11)
}
  0x97   : > { %p4329_p2 = scmp.ne.s32.totalorder %s4316_s19, 0  ;;  %s4330_s5 = smov 8  }
  0x98   : > { %s4331_s8 = smov 128   ;;  %s4332_s11 = sld [smem:[#allocation34_spill]] }
  0x99   : > { %2953 = dma.hbm_to_vmem [thread:$0]  (!%p4329_p2), %s4327_s21, 256, %s500_s29, [#allocation7], %s4331_s8, %s4331_s8, %s4330_s5  }
  0x9a   : > { %s610_s20 = scalar_lea.vmem [#allocation13], %s3689_s22 }
  0x9b   : > { %s617_s6 = sshll.u32 %s610_s20, 4  ;;  %s3806_s6 = int_to_ptr.vmem [resolvable:$true] %s617_s6 }
  0x9e   : > { %s3803_s24 = scalar_lea.hbm %s4332_s11, %s3692_s1  ;;  %s3292_s17 = scalar_lea.hbm %s4332_s11, 2048 }
  0x9f   : > { %s3287_s23 = scalar_lea.hbm %s3803_s24, 1024  ;;  %p3293_p12 = scmp.lt.u32.totalorder %s3803_s24, %s4332_s11 }
  0xa0   : > { %p3288_p11 = scmp.ne.s32.totalorder %s3803_s24, %s3287_s23  ;;  %p3294_p0 = scmp.lt.u32.totalorder %s3292_s17, %s3287_s23 }
  0xa1   : > { %p3296_p7 = scmp.lt.u32.totalorder %s3287_s23, %s3803_s24 }
  0xa2   : > { %p3290_p6 = pnand %p3288_p11, %p3713_p13  ;;  %p3295_p3 = por %p3294_p0, %p3293_p12 }
  0xa4   : > { %p3291_p9 = pneg %p3290_p6  ;;  %p3297_p8 = por %p3296_p7, %p3295_p3 }
  0xa6   : > { %p3298_p10 = pnand %p3297_p8, %p3291_p9 }
  0xa8   : > { %3301 = shalt.err (!%p3298_p10)
}
  0xa9   : > { %s3302_s30 = scalar_lea.vmem %s3806_s6, 1024  ;;  %s3489_s20 = smov [#allocation13]  }
  0xaa   : > { %p3303_p1 = scmp.ne.s32.totalorder %s3806_s6, %s3302_s30  ;;  %s3307_s10 = sshll.u32 %s3489_s20, 4  ;;  %s3308_s10 = int_to_ptr.vmem [resolvable:$false] %s3307_s10 }
  0xab   : > { %s3309_s29 = scalar_lea.vmem %s3308_s10, 2048  ;;  %p3310_p6 = scmp.lt.s32.totalorder %s3806_s6, %s3308_s10 }
  0xac   : > { %p3305_p4 = pnand %p3303_p1, %p3713_p13  ;;  %p3311_p2 = scmp.lt.s32.totalorder %s3309_s29, %s3302_s30 }
  0xae   : > { %p3306_p11 = pneg %p3305_p4  ;;  %p3312_p12 = por %p3311_p2, %p3310_p6 }
  0xb0   : > { %p3313_p0 = pnand %p3312_p12, %p3306_p11 }
  0xb2   : > { %3316 = shalt.err (!%p3313_p0)
}
  0xb3   : > { %p4333_p9 = scmp.ne.s32.totalorder %s4323_s12, 0  ;;  %s3490_s23 = smov [#allocation8]  }
  0xb4   : > { %s512_s17 = sshll.u32 %s3490_s23, 4  ;;  %s3491_s18 = smov [#allocation9]   ;;  %s513_s17 = int_to_ptr.vmem [resolvable:$true] %s512_s17 }
  0xb5   : > { %2969 = dma.hbm_to_vmem [thread:$0]  (!%p4333_p9), %s3803_s24, 1024, %s3806_s6, %s3707_s14, %s3485_s16, %s3485_s16, %s3486_s3  }
  0xb6   : > { %s529_s27 = sshll.u32 %s3491_s18, 4  ;;  %s4334_s2 = sld [smem:[#allocation26_spill]]  ;;  %s530_s27 = int_to_ptr.vmem [resolvable:$true] %s529_s27 }
  0xbc   : > { %s3317_s10 = scalar_lea.hbm %s4334_s2, 256 }
  0xbd   : > { %p3318_p2 = scmp.ne.s32.totalorder %s4334_s2, %s3317_s10  ;;  %p3324_p8 = scmp.lt.u32.totalorder %s3317_s10, %s4334_s2 }
  0xbf   : > { %p3320_p3 = pnand %p3318_p2, %p4328_p5 }
  0xc1   : > { %p3321_p7 = pneg %p3320_p3 }
  0xc3   : > { %p3326_p10 = pnand %p3324_p8, %p3321_p7 }
  0xc5   : > { %3329 = shalt.err (!%p3326_p10)
}
  0xc6   : > { %s3330_s24 = scalar_lea.vmem %s513_s17, 256  ;;  %p3338_p6 = scmp.lt.s32.totalorder %s513_s17, %s513_s17 }
  0xc7   : > { %p3331_p1 = scmp.ne.s32.totalorder %s513_s17, %s3330_s24  ;;  %p3339_p12 = scmp.lt.s32.totalorder %s3330_s24, %s3330_s24 }
  0xc9   : > { %p3333_p4 = pnand %p3331_p1, %p4328_p5  ;;  %p3340_p0 = por %p3339_p12, %p3338_p6 }
  0xcb   : > { %p3334_p11 = pneg %p3333_p4 }
  0xcd   : > { %p3341_p9 = pnand %p3340_p0, %p3334_p11 }
  0xcf   : > { %3344 = shalt.err (!%p3341_p9)
}
  0xd0   : > { %p4335_p2 = scmp.ne.s32.totalorder %s4316_s19, 0  ;;  %s3345_s23 = scalar_lea.hbm %s4258_s4, 16 }
  0xd1   : > { %p3346_p3 = scmp.ne.s32.totalorder %s4258_s4, %s3345_s23  ;;  %p3352_p8 = scmp.lt.u32.totalorder %s3345_s23, %s4258_s4 }
  0xd2   : > { %2956 = dma.hbm_to_vmem [thread:$0]  (!%p4335_p2), %s4334_s2, 256, %s513_s17, [#allocation7], %s4331_s8, %s4331_s8, %s4330_s5  }
  0xd3   : > { %p3348_p9 = pnand %p3346_p3, %p4328_p5 }
  0xd5   : > { %p3349_p7 = pneg %p3348_p9 }
  0xd7   : > { %p3354_p10 = pnand %p3352_p8, %p3349_p7 }
  0xd9   : > { %3357 = shalt.err (!%p3354_p10)
}
  0xda   : > { %s3358_s29 = scalar_lea.vmem %s530_s27, 16  ;;  %s3365_s5 = scalar_lea.vmem %s530_s27, 32 }
  0xdb   : > { %p3359_p1 = scmp.ne.s32.totalorder %s530_s27, %s3358_s29  ;;  %p3366_p6 = scmp.lt.s32.totalorder %s530_s27, %s530_s27 }
  0xdc   : > { %p3367_p12 = scmp.lt.s32.totalorder %s3365_s5, %s3358_s29 }
  0xdd   : > { %p3361_p4 = pnand %p3359_p1, %p4328_p5 }
  0xde   : > { %p3368_p0 = por %p3367_p12, %p3366_p6 }
  0xdf   : > { %p3362_p11 = pneg %p3361_p4 }
  0xe1   : > { %p3369_p13 = pnand %p3368_p0, %p3362_p11 }
  0xe3   : > { %3372 = shalt.err (!%p3369_p13)
}
  0xe4   : > { %2959 = dma.hbm_to_vmem [thread:$0]  (!%p4335_p2), %s4258_s4, 16, %s530_s27, [#allocation10]  }
  0xe5   : > { %s3876_s15 = scalar_lea.hbm %s4267_s13, %s3692_s1  ;;  %s637_s11 = scalar_lea.vmem [#allocation14], %s3689_s22 }
  0xe6   : > { %s644_s21 = sshll.u32 %s637_s11, 4  ;;  %s3373_s19 = scalar_lea.hbm %s3876_s15, 1024  ;;  %s3879_s21 = int_to_ptr.vmem [resolvable:$true] %s644_s21 }
  0xe7   : > { %p3374_p13 = scmp.ne.s32.totalorder %s3876_s15, %s3373_s19  ;;  %p4336_p5 = scmp.ne.s32.totalorder %s4324_s9, 0 }
  0xe8   : > { %s3378_s23 = scalar_lea.hbm %s4267_s13, 2048  ;;  %p3379_p2 = scmp.lt.u32.totalorder %s3876_s15, %s4267_s13 }
  0xe9   : > { %p3376_p3 = pnand %p3374_p13, %p4336_p5  ;;  %p3380_p7 = scmp.lt.u32.totalorder %s3378_s23, %s3373_s19 }
  0xea   : > { %p3382_p10 = scmp.lt.u32.totalorder %s3373_s19, %s3876_s15 }
  0xeb   : > { %p3377_p9 = pneg %p3376_p3  ;;  %p3381_p8 = por %p3380_p7, %p3379_p2 }
  0xed   : > { %p3383_p1 = por %p3382_p10, %p3381_p8 }
  0xef   : > { %p3384_p4 = pnand %p3383_p1, %p3377_p9 }
  0xf1   : > { %3387 = shalt.err (!%p3384_p4)
}
  0xf2   : > { %s3388_s22 = scalar_lea.vmem %s3879_s21, 1024  ;;  %s3492_s20 = smov [#allocation14]  }
  0xf3   : > { %p3389_p11 = scmp.ne.s32.totalorder %s3879_s21, %s3388_s22  ;;  %s3393_s30 = sshll.u32 %s3492_s20, 4  ;;  %s3394_s30 = int_to_ptr.vmem [resolvable:$false] %s3393_s30 }
  0xf4   : > { %s3395_s10 = scalar_lea.vmem %s3394_s30, 2048  ;;  %p3396_p0 = scmp.lt.s32.totalorder %s3879_s21, %s3394_s30 }
  0xf5   : > { %p3391_p6 = pnand %p3389_p11, %p4336_p5  ;;  %p3397_p13 = scmp.lt.s32.totalorder %s3395_s10, %s3388_s22 }
  0xf7   : > { %p3392_p12 = pneg %p3391_p6  ;;  %p3398_p3 = por %p3397_p13, %p3396_p0 }
  0xf9   : > { %p3399_p2 = pnand %p3398_p3, %p3392_p12 }
  0xfb   : > { %3402 = shalt.err (!%p3399_p2)
}
  0xfc   : > { %p4337_p9 = scmp.ne.s32.totalorder %s4323_s12, 0  ;;  %p4338_p5 = scmp.ne.s32.totalorder %s4315_s0, 0 }
  0xfd   : > { %p4339_p7 = scmp.eq.s32.totalorder (!%p4338_p5), %s3620_s28, 0 }
  0xfe   : > { %2972 = dma.hbm_to_vmem [thread:$0]  (!%p4337_p9), %s3876_s15, 1024, %s3879_s21, %s3707_s14, %s3485_s16, %s3485_s16, %s3486_s3  }
  0xff   : > { %674 = sbr.rel (%p4338_p5) target bundleno = 4517 (0x11a5), region = 88 }
 0x106   : > { %3446 = dma.done.wait (%p4339_p7), [#allocation4], 256   ;;  %p4340_p8 = pmov %p4339_p7 }
 0x107   : > { %p4341_p10 = pmov %p4339_p7 }
 0x108   : > { %3448 = vsyncadd (%p4340_p8), [#allocation4], 4294967040 }
 0x109   : > { %3450 = dma.done.wait (%p4341_p10), [#allocation7], 512   ;;  %p4342_p1 = pmov %p4339_p7 }
 0x10b   : > { %3452 = vsyncadd (%p4342_p1), [#allocation7], 4294966784  ;;  %p4343_p4 = pmov %p4342_p1 }
 0x10c   : > { %p4344_p11 = pmov %p4342_p1 }
 0x10d   : > { %3454 = dma.done.wait (%p4343_p4), [#allocation10], 16  }
 0x10e   : > { %3456 = vsyncadd (%p4344_p11), [#allocation10], 4294967280  ;;  %s4345_s0 = sld [smem:[#allocation21_spill]]  ;;  %s692_s12 = sand.u32 1, %s3620_s28  }
 0x10f   : > { %s694_s14 = sand.u32 1, %s3471_s25   ;;  %s693_s16 = scalar_lea.sflag [#allocation4], %s692_s12 }
 0x110   : > { %s2601_s9 = sshll.u32 %s694_s14, 6 }
 0x111   : > { %s3922_s3 = scalar_lea.vmem [#allocation11], %s2601_s9 }
 0x114   : > { %p4346_p6 = scmp.ne.s32.totalorder %s4345_s0, 0 }
 0x116   : > { %3458 = dma.done.wait (%p4346_p6), %s693_s16, 3328  }
 0x117   : > { %3460 = vsyncadd (%p4346_p6), %s693_s16, 4294963968  ;;  %s3928_s29 = sshll.u32 %s694_s14, 4  ;;  %v833_v0 = vlaneseq  ;;  %p808_p12 = scmp.lt.s32.totalorder %s3620_s28, 1 }
 0x118   : > { %s4350_s20 = sld [smem:[#allocation33_spill]]  ;;  %s4351_s12 = sld [smem:[#allocation35_spill]] }
 0x119   : > { %v3931_v1 = vand.u32 127, %v833_v0  ;;  %s3934_s5 = scalar_select %p808_p12, %s3620_s28, 1 }
 0x11a   : > { %s4352_s8 = sld [smem:[#allocation36_spill]]  ;;  %s4353_s15 = sld [smem:[#allocation37_spill]] }
 0x11b   : > { %vm835_vm0 = vcmp.lt.s32.totalorder %v3931_v1, 32  ;;  %s4354_s6 = sld [smem:[#allocation38_spill]]  ;;  %s705_s23 = scalar_lea.vmem [#allocation12], %s3928_s29 }
 0x11c   : > { %s3970_s18 = scalar_lea.vmem [#allocation13], %s2601_s9  ;;  %s3972_s1 = scalar_lea.vmem [#allocation14], %s2601_s9 }
 0x11d   : > { %p4355_p0 = scmp.ne.s32.totalorder %s3620_s28, 0 }
 0x11e   : > { %s819_s30 = scalar_lea.vmem %s4350_s20, %s3934_s5  ;;  %s822_s14 = scalar_lea.vmem %s4351_s12, %s3934_s5  ;;  %v840_v2 = vld [vmem:[#allocation3] sm:$0xff] (!%p4355_p0)  ;;  %v841_v3 = vld [vmem:[#allocation3 + $0x8] sm:$0xff] (!%p4355_p0)  ;;  %v2607_v23 = vld [vmem:[#allocation9] ss:$0 sm:$0xff] (!%p4355_p0) }
 0x11f   : > { %839 = sbr.rel (%p4355_p0) target bundleno = 604 (0x25c), region = 124  ;;  %844 = vadd.xlane.f32.xlu0 (!%p4355_p0), %v840_v2  ;;  %s4356_s7 = sld [smem:[#allocation27_spill]] (!%p4355_p0) }
 0x120   : > { %s825_s17 = scalar_lea.vmem %s4352_s8, %s3934_s5  ;;  %s828_s11 = scalar_lea.vmem %s4353_s15, %s3934_s5 }
 0x121   : > { %s831_s27 = scalar_lea.vmem %s4354_s6, %s3934_s5 }
 0x123   : > { %846 = vadd.xlane.f32.xlu0 (!%p4355_p0), %v841_v3 }
 0x125   : > { %v2606_v21 = vld [vmem:[%s4356_s7] ss:$0 sm:$0xff] (!%p4355_p0) }
 0x1ac   : > { %v845_v4 = vpop.xlane.xlu0 %844 }
 0x1ad   : > { %v848_v5 = vmul.f32 0.03125, %v845_v4 }
 0x1af   : > { %v850_v6 = vsub.f32 %v840_v2, %v848_v5 }
 0x1b0   : > { %v847_v7 = vpop.xlane.xlu0 %846 }
 0x1b1   : > { %v849_v8 = vmul.f32 0.03125, %v847_v7  ;;  %v854_v9 = vsel %vm835_vm0, %v850_v6, 0.0 }
 0x1b2   : > { %v856_v10 = vmul.f32 %v854_v9, %v854_v9 }
 0x1b3   : > { %v851_v11 = vsub.f32 %v841_v3, %v849_v8 }
 0x1b4   : > { %858 = vadd.xlane.f32.xlu1 %v856_v10 }
 0x1b5   : > { %v855_v12 = vsel %vm835_vm0, %v851_v11, 0.0 }
 0x1b6   : > { %v857_v13 = vmul.f32 %v855_v12, %v855_v12 }
 0x1b8   : > { %860 = vadd.xlane.f32.xlu1 %v857_v13 }
 0x241   : > { %v859_v14 = vpop.xlane.xlu1 %858 }
 0x242   : > { %v862_v15 = vmul.f32 0.03125, %v859_v14 }
 0x244   : > { %v864_v16 = vadd.f32 1e-12, %v862_v15 }
 0x245   : > { %v861_v17 = vpop.xlane.xlu1 %860 }
 0x246   : > { %3042 = vrsqrt.f32 %v864_v16  ;;  %v863_v18 = vmul.f32 0.03125, %v861_v17 }
 0x248   : > { %v865_v19 = vadd.f32 1e-12, %v863_v18 }
 0x24a   : > { %3044 = vrsqrt.f32 %v865_v19 }
 0x250   : > { %v3043_v20 = vpop.eup %3042 }
 0x251   : > { %v868_v22 = vmul.f32 %v3043_v20, %v854_v9 }
 0x253   : > { %v876_v24 = vmul.f32 %v2606_v21, %v868_v22 }
 0x254   : > { %v3045_v25 = vpop.eup %3044 }
 0x255   : > { %v884_v26 = vadd.f32 %v2607_v23, %v876_v24  ;;  %v869_v27 = vmul.f32 %v3045_v25, %v855_v12 }
 0x257   : > { %886 = vst [vmem:[#allocation2] sm:$0xff] %v884_v26  ;;  %v877_v28 = vmul.f32 %v2606_v21, %v869_v27 }
 0x259   : > { %v885_v29 = vadd.f32 %v2607_v23, %v877_v28 }
 0x25b   : > { %887 = vst [vmem:[#allocation2 + $0x8] sm:$0xff] %v885_v29 }
 0x25c PF: > { %v3101_v30 = vld [vmem:[%s3922_s3] sm:$0xff]   ;;  %v3493_v31 = vmov 0.0   ;;  %v3102_v32 = vld [vmem:[%s3922_s3 + $0x8] sm:$0xff]   ;;  %vm3494_vm1 = vmmov 0   ;;  %v3103_v33 = vld [vmem:[%s3922_s3 + $0x10] sm:$0xff]   ;;  %s4357_s20 = sld [smem:[#allocation29_spill]] }
 0x25d   : > { %2744 = vmatprep.subr.bf16.mxu0 %v3493_v31  ;;  %2760 = vmatprep.mubr.msk.bf16.mxu0 %vm3494_vm1, %v3493_v31  ;;  %v3104_v34 = vld [vmem:[%s3922_s3 + $0x18] sm:$0xff]   ;;  %v3105_v35 = vld [vmem:[%s3922_s3 + $0x20] sm:$0xff]   ;;  %v3106_v36 = vld [vmem:[%s3922_s3 + $0x28] sm:$0xff]   ;;  %vm1011_vm2 = vcmask 64512   ;;  %vm1099_vm4 = vcmask 130048   ;;  %s3496_s0 = smov 64  }
 0x25e   : > { %2745 = vmatpush3.bf16.msra.mxu0 %v3101_v30  ;;  %v3107_v37 = vld [vmem:[%s3922_s3 + $0x30] sm:$0xff]   ;;  %v3108_v38 = vld [vmem:[%s3922_s3 + $0x38] sm:$0xff]   ;;  %s3495_s3 = smov 96   ;;  %vm4025_vm3 = vmpackc.low %vm1011_vm2, %vm1011_vm2  ;;  %s3497_s12 = smov 88   ;;  %vm1849_vm5 = vcmask 195584   ;;  %vm1876_vm6 = vcmask 261120  }
 0x25f   : > { %2746 = vmatprep.subr.bf16.mxu0 %v3493_v31  ;;  %v4000_v39 = vld [vmem:[#allocation2] sm:$0xff]  ;;  %v4035_v56 = vld [vmem:[#allocation6 + $0x8] sm:$0xff]  ;;  %s3498_s16 = smov 120   ;;  %s3499_s8 = smov 56  }
 0x260   : > { %v4037_v59 = vld [vmem:[#allocation6] sm:$0xff]  ;;  %s3500_s24 = smov 80   ;;  %s3501_s15 = smov 72  }
 0x261   : > { %s3502_s21 = smov 104   ;;  %s3503_s6 = smov 112  }
 0x262   : > { %2747 = vmatpush3.bf16.msra.mxu0 %v3102_v32  ;;  %v4002_v40 = vld [vmem:[#allocation2 + $0x8] sm:$0xff]  ;;  %s4358_s10 = scalar_lea.vmem %s4357_s20, %s3934_s5  ;;  %s3504_s2 = smov 48  }
 0x263   : > { %2748 = vmatprep.subr.bf16.mxu0 %v3493_v31  ;;  %v892_v41 = vpack.c.bf16 %v4002_v40, %v4000_v39  ;;  %v2608_v42 = vld [vmem:[%s4358_s10] ss:$0 sm:$0xff]  ;;  %s3505_s9 = smov 8   ;;  %s3506_s7 = smov 40  }
 0x264   : > { %s3507_s19 = smov 16   ;;  %s3508_s22 = smov 24  }
 0x265   : > { %s4361_s20 = sld [smem:[#allocation31_spill]]  ;;  %p2667_p13 = scmp.ne.s32.totalorder %s3620_s28, 1 }
 0x266   : > { %2749 = vmatpush3.bf16.msra.mxu0 %v3103_v33 }
 0x267   : > { %2750 = vmatprep.subr.bf16.mxu0 %v3493_v31 }
 0x26a   : > { %2751 = vmatpush3.bf16.msra.mxu0 %v3104_v34 }
 0x26b   : > { %2752 = vmatprep.subr.bf16.mxu0 %v3493_v31  ;;  %s4362_s10 = scalar_lea.vmem %s4361_s20, %s3934_s5 }
 0x26e   : > { %2753 = vmatpush3.bf16.msra.mxu0 %v3105_v35 }
 0x26f   : > { %2754 = vmatprep.subr.bf16.mxu0 %v3493_v31 }
 0x272   : > { %2755 = vmatpush3.bf16.msra.mxu0 %v3106_v36 }
 0x273   : > { %2756 = vmatprep.subr.bf16.mxu0 %v3493_v31 }
 0x276   : > { %2757 = vmatpush3.bf16.msra.mxu0 %v3107_v37 }
 0x277   : > { %2758 = vmatprep.subr.bf16.mxu0 %v3493_v31 }
 0x27a   : > { %2759 = vmatpush3.bf16.msra.mxu0 %v3108_v38 }
 0x27d   : > { %2761 = vmatmul.mubr.bf16.vlgmr.msra.gmra.mrb[0].mxu0 %v892_v41 }
 0x350   : > { %v998_v43 = vpop.f32.mrb[0].mxu0 }
 0x351   : > { %v4012_v44 = vadd.f32 %v2608_v42, %v998_v43  ;;  %v2762_v45 = vpop.f32.mrb[1].mxu0 }
 0x352   : > { %v1001_v46 = vpop.f32.mrb[2].mxu0 }
 0x353   : > { %v4014_v47 = vadd.f32 %v2608_v42, %v1001_v46  ;;  %v2763_v48 = vpop.f32.mrb[3].mxu0  ;;  %2768 = vmatprep.mubr.msk.f32.mxu1 %vm1011_vm2, %v4012_v44 }
 0x355   : > { %v4020_v49 = vpack.i.bf16 %v4014_v47, %v4012_v44 }
 0x357   : > { %3047 = vrot.lane.b32.xlu0 %v4020_v49, %s3495_s3 }
 0x3c9   : > { %v3048_v50 = vpop.permute.xlu0 %3047 }
 0x3ca   : > { %v3050_v51 = vunpack.i.h.bf16 %v3048_v50  ;;  %v3049_v52 = vunpack.i.l.bf16 %v3048_v50 }
 0x3cc   : > { %v2875_v54 = vpack.c.bf16 %v3050_v51, %v3049_v52 }
 0x3ce   : > { %2877 = vmatprep.subr.msk.bf16.mxu1 %vm4025_vm3, %v2875_v54 }
 0x3cf   : > { %2880 = vmatpush3.bf16.xpose.msk.msra.mxu1 %vm4025_vm3, %v2875_v54 }
 0x3d6   : > { %2769 = vmatmul.mubr.msk.f32.vlgmr.msra.gmra.mrb[0].mxu1 %vm1011_vm2, %v4014_v47 }
 0x4a9   : > { %v2770_v55 = vpop.f32.mrb[0].mxu1 }
 0x4aa   : > { %v1096_v57 = vmul.f32 0.35355338, %v2770_v55  ;;  %v1086_v58 = vpop.f32.mrb[1].mxu1 }
 0x4ab   : > { %v1095_v60 = vmul.f32 0.35355338, %v1086_v58 }
 0x4ac   : > { %v1098_v61 = vadd.f32 %v1096_v57, %v4035_v56 }
 0x4ad   : > { %v1097_v62 = vadd.f32 %v1095_v60, %v4037_v59 }
 0x4ae   : > { %v1103_v63 = vsel %vm1099_vm4, %v1098_v61, -inf }
 0x4af   : > { %1104 = vmax.xlane.f32.xlu1 %v1103_v63  ;;  %v1100_v0 = vsel %vm1099_vm4, %v1097_v62, -inf }
 0x4b0   : > { %1101 = vmax.xlane.f32.xlu0 %v1100_v0 }
 0x4c0   : > { %3052 = vrot.lane.b32.xlu1 %v4020_v49, %s3496_s0 }
 0x4c4   : > { %3057 = vrot.lane.b32.xlu1 %v4020_v49, %s3497_s12  ;;  %s4363_s12 = sld [smem:[#allocation32_spill]] }
 0x4c6   : > { %1211 = vrot.lane.b32.xlu0 %v4014_v47, %s3498_s16 }
 0x53c   : > { %v1105_v2 = vpop.xlane.xlu1 %1104 }
 0x53d   : > { %v1107_v3 = vsub.f32 %v1098_v61, %v1105_v2  ;;  %v1102_v4 = vpop.xlane.xlu0 %1101 }
 0x53e   : > { %v1106_v5 = vsub.f32 %v1097_v62, %v1102_v4 }
 0x53f   : > { %v1110_v6 = vmul.f32 1.442695, %v1107_v3 }
 0x540   : > { %v1108_v7 = vmul.f32 1.442695, %v1106_v5  ;;  %v3053_v8 = vpop.permute.xlu1 %3052 }
 0x541   : > { %3127 = vpow2.f32 %v1110_v6  ;;  %v3055_v9 = vunpack.i.h.bf16 %v3053_v8  ;;  %v3054_v10 = vunpack.i.l.bf16 %v3053_v8  ;;  %v1212_v27 = vpop.permute.xlu0 %1211 }
 0x542   : > { %3129 = vpow2.f32 %v1108_v7 }
 0x543   : > { %v2881_v11 = vpack.c.bf16 %v3055_v9, %v3054_v10 }
 0x544   : > { %v3058_v12 = vpop.permute.xlu1 %3057 }
 0x545   : > { %v3060_v13 = vunpack.i.h.bf16 %v3058_v12  ;;  %v3059_v14 = vunpack.i.l.bf16 %v3058_v12  ;;  %2882 = vmatprep.subr.bf16.mxu1 %v2881_v11 }
 0x546   : > { %2884 = vmatpush3.bf16.msra.mxu1 %v2881_v11 }
 0x547   : > { %v2885_v15 = vpack.c.bf16 %v3060_v13, %v3059_v14 }
 0x549   : > { %2887 = vmatprep.subr.msk.bf16.mxu1 %vm4025_vm3, %v2885_v15 }
 0x54b   : > { %v3128_v16 = vpop.eup %3127 }
 0x54c   : > { %v1115_v17 = vsel %vm1099_vm4, %v3128_v16, 0.0  ;;  %v3130_v18 = vpop.eup %3129 }
 0x54d   : > { %1116 = vadd.xlane.f32.xlu1 %v1115_v17  ;;  %v1112_v19 = vsel %vm1099_vm4, %v3130_v18, 0.0 }
 0x551   : > { %1113 = vadd.xlane.f32.xlu1 %v1112_v19 }
 0x562   : > { %1209 = vrot.lane.b32.xlu1 %v4012_v44, %s3498_s16  ;;  %s4364_s16 = scalar_lea.vmem %s4363_s12, %s3934_s5 }
 0x5da   : > { %v1117_v20 = vpop.xlane.xlu1 %1116 }
 0x5db   : > { %3131 = vrcp.f32 %v1117_v20 }
 0x5de   : > { %v1114_v21 = vpop.xlane.xlu1 %1113 }
 0x5df   : > { %3133 = vrcp.f32 %v1114_v21 }
 0x5e2   : > { %v1210_v26 = vpop.permute.xlu1 %1209 }
 0x5e5   : > { %v3132_v22 = vpop.eup %3131 }
 0x5e6   : > { %v1121_v25 = vmul.f32 %v3132_v22, %v3128_v16 }
 0x5e9   : > { %v3134_v23 = vpop.eup %3133 }
 0x5ea   : > { %v1120_v24 = vmul.f32 %v3134_v23, %v3130_v18 }
 0x5ec   : > { %2775 = vmatprep.mubr.msk.f32.mxu1 %vm1099_vm4, %v1120_v24 }
 0x5ed   : > { %2776 = vmatmul.mubr.msk.f32.vlgmr.msra.gmra.mrb[2].mxu1 %vm1099_vm4, %v1121_v25 }
 0x5ee   : > { %2890 = vmatpush3.bf16.xpose.msk.msra.mxu1 %vm4025_vm3, %v2885_v15  ;;  %2782 = vmatprep.mubr.msk.f32.mxu1 %vm1011_vm2, %v1210_v26 }
 0x5f5   : > { %2783 = vmatmul.mubr.msk.f32.vlgmr.msra.gmra.mrb[4].mxu1 %vm1011_vm2, %v1212_v27 }
 0x6c0   : > { %v4057_v28 = vpop.f32.mrb[2].mxu1 }
 0x6c1   : > { %v4059_v29 = vpop.f32.mrb[3].mxu1 }
 0x6c8   : > { %v2784_v30 = vpop.f32.mrb[4].mxu1 }
 0x6c9   : > { %v1301_v32 = vmul.f32 0.35355338, %v2784_v30  ;;  %v1291_v33 = vpop.f32.mrb[5].mxu1 }
 0x6ca   : > { %v1300_v34 = vmul.f32 0.35355338, %v1291_v33 }
 0x6cb   : > { %v1303_v35 = vadd.f32 %v1301_v32, %v4035_v56 }
 0x6cc   : > { %v1302_v36 = vadd.f32 %v1300_v34, %v4037_v59 }
 0x6cd   : > { %v1307_v37 = vsel %vm1099_vm4, %v1303_v35, -inf }
 0x6ce   : > { %1308 = vmax.xlane.f32.xlu0 %v1307_v37  ;;  %v1304_v38 = vsel %vm1099_vm4, %v1302_v36, -inf }
 0x6cf   : > { %1305 = vmax.xlane.f32.xlu1 %v1304_v38 }
 0x6e0   : > { %3062 = vrot.lane.b32.xlu1 %v4020_v49, %s3499_s8 }
 0x6e4   : > { %3067 = vrot.lane.b32.xlu0 %v4020_v49, %s3500_s24  ;;  %3072 = vrot.lane.b32.xlu1 %v4020_v49, %s3501_s15 }
 0x6e8   : > { %1617 = vrot.lane.b32.xlu0 %v4012_v44, %s3502_s21  ;;  %1413 = vrot.lane.b32.xlu1 %v4012_v44, %s3503_s6 }
 0x75b   : > { %v1309_v41 = vpop.xlane.xlu0 %1308 }
 0x75c   : > { %v1311_v42 = vsub.f32 %v1303_v35, %v1309_v41  ;;  %v1306_v43 = vpop.xlane.xlu1 %1305 }
 0x75d   : > { %v1310_v45 = vsub.f32 %v1302_v36, %v1306_v43 }
 0x75e   : > { %v1314_v46 = vmul.f32 1.442695, %v1311_v42 }
 0x75f   : > { %v1312_v48 = vmul.f32 1.442695, %v1310_v45  ;;  %v3068_v50 = vpop.permute.xlu0 %3067 }
 0x760   : > { %3135 = vpow2.f32 %v1314_v46  ;;  %v3063_v51 = vpop.permute.xlu1 %3062  ;;  %v3070_v52 = vunpack.i.h.bf16 %v3068_v50  ;;  %v3069_v54 = vunpack.i.l.bf16 %v3068_v50 }
 0x761   : > { %v3065_v55 = vunpack.i.h.bf16 %v3063_v51  ;;  %v3064_v57 = vunpack.i.l.bf16 %v3063_v51  ;;  %3137 = vpow2.f32 %v1312_v48 }
 0x762   : > { %v2895_v44 = vpack.c.bf16 %v3070_v52, %v3069_v54 }
 0x763   : > { %v2891_v58 = vpack.c.bf16 %v3065_v55, %v3064_v57  ;;  %v1618_v60 = vpop.permute.xlu0 %1617 }
 0x764   : > { %2810 = vmatprep.mubr.msk.f32.mxu0 %vm1011_vm2, %v1618_v60  ;;  %v3073_v61 = vpop.permute.xlu1 %3072 }
 0x765   : > { %v3075_v62 = vunpack.i.h.bf16 %v3073_v61  ;;  %v3074_v63 = vunpack.i.l.bf16 %v3073_v61  ;;  %2892 = vmatprep.subr.bf16.mxu1 %v2891_v58 }
 0x766   : > { %2894 = vmatpush3.bf16.msra.mxu1 %v2891_v58 }
 0x767   : > { %v2905_v0 = vpack.c.bf16 %v3075_v62, %v3074_v63  ;;  %2897 = vmatprep.subr.msk.bf16.mxu1 %vm4025_vm3, %v2895_v44 }
 0x768   : > { %v1414_v6 = vpop.permute.xlu1 %1413 }
 0x769   : > { %2907 = vmatprep.subr.msk.bf16.mxu0 %vm4025_vm3, %v2905_v0 }
 0x76a   : > { %v3136_v2 = vpop.eup %3135  ;;  %2910 = vmatpush3.bf16.xpose.msk.msra.mxu0 %vm4025_vm3, %v2905_v0 }
 0x76b   : > { %v1319_v3 = vsel %vm1099_vm4, %v3136_v2, 0.0  ;;  %2820 = vmatprep.subr.bf16.mxu0 %v3493_v31  ;;  %v3138_v4 = vpop.eup %3137 }
 0x76c   : > { %1320 = vadd.xlane.f32.xlu1 %v1319_v3  ;;  %v1316_v5 = vsel %vm1099_vm4, %v3138_v4, 0.0 }
 0x770   : > { %1317 = vadd.xlane.f32.xlu1 %v1316_v5 }
 0x781   : > { %1415 = vrot.lane.b32.xlu1 %v4014_v47, %s3503_s6 }
 0x785   : > { %1619 = vrot.lane.b32.xlu1 %v4014_v47, %s3502_s21 }
 0x7f9   : > { %v1321_v7 = vpop.xlane.xlu1 %1320 }
 0x7fa   : > { %3139 = vrcp.f32 %v1321_v7 }
 0x7fd   : > { %v1318_v8 = vpop.xlane.xlu1 %1317 }
 0x7fe   : > { %3141 = vrcp.f32 %v1318_v8 }
 0x801   : > { %v1416_v9 = vpop.permute.xlu1 %1415 }
 0x804   : > { %v3140_v11 = vpop.eup %3139 }
 0x805   : > { %v1620_v10 = vpop.permute.xlu1 %1619  ;;  %v1325_v14 = vmul.f32 %v3140_v11, %v3136_v2 }
 0x806   : > { %2811 = vmatmul.mubr.msk.f32.vlgmr.msra.gmra.mrb[4].mxu0 %vm1011_vm2, %v1620_v10 }
 0x807   : > { %2824 = vmatprep.mubr.msk.bf16.mxu0 %vm3494_vm1, %v3493_v31 }
 0x808   : > { %v3142_v12 = vpop.eup %3141 }
 0x809   : > { %v1324_v13 = vmul.f32 %v3142_v12, %v3138_v4 }
 0x80b   : > { %2789 = vmatprep.mubr.msk.f32.mxu1 %vm1099_vm4, %v1324_v13 }
 0x80c   : > { %2790 = vmatmul.mubr.msk.f32.vlgmr.msra.gmra.mrb[6].mxu1 %vm1099_vm4, %v1325_v14 }
 0x80d   : > { %2900 = vmatpush3.bf16.xpose.msk.msra.mxu1 %vm4025_vm3, %v2895_v44  ;;  %2796 = vmatprep.mubr.msk.f32.mxu1 %vm1011_vm2, %v1414_v6 }
 0x814   : > { %2797 = vmatmul.mubr.msk.f32.vlgmr.msra.gmra.mrb[8].mxu1 %vm1011_vm2, %v1416_v9 }
 0x8d9   : > { %v2812_v47 = vpop.f32.mrb[4].mxu0 }
 0x8da   : > { %v1699_v15 = vpop.f32.mrb[5].mxu0  ;;  %v1709_v26 = vmul.f32 0.35355338, %v2812_v47 }
 0x8db   : > { %v1708_v22 = vmul.f32 0.35355338, %v1699_v15  ;;  %v3109_v15 = vld [vmem:[%s705_s23] sm:$0xff]  }
 0x8dc   : > { %v1711_v33 = vadd.f32 %v1709_v26, %v4035_v56  ;;  %2821 = vmatpush3.bf16.msra.mxu0 %v3109_v15 }
 0x8dd   : > { %v1710_v30 = vadd.f32 %v1708_v22, %v4037_v59  ;;  %2822 = vmatprep.subr.bf16.mxu0 %v3493_v31 }
 0x8de   : > { %v1715_v34 = vsel %vm1099_vm4, %v1711_v33, -inf }
 0x8df   : > { %v2791_v16 = vpop.f32.mrb[6].mxu1  ;;  %v1712_v32 = vsel %vm1099_vm4, %v1710_v30, -inf }
 0x8e0   : > { %v1404_v17 = vpop.f32.mrb[7].mxu1 }
 0x8e1   : > { %v3086_v18 = vpack.i.bf16 %v2791_v16, %v1404_v17  ;;  %v3110_v16 = vld [vmem:[%s705_s23 + $0x8] sm:$0xff]  }
 0x8e2   : > { %2823 = vmatpush3.bf16.msra.mxu0 %v3110_v16  ;;  %v2646_v16 = vld [vmem:[%s819_s30] ss:$0 sm:$0xff] }
 0x8e3   : > { %2848 = vmatprep.subr.bf16.mxu0 %v3493_v31 }
 0x8e7   : > { %v2798_v19 = vpop.f32.mrb[8].mxu1 }
 0x8e8   : > { %v1505_v20 = vmul.f32 0.35355338, %v2798_v19  ;;  %v1495_v21 = vpop.f32.mrb[9].mxu1 }
 0x8e9   : > { %v1504_v23 = vmul.f32 0.35355338, %v1495_v21 }
 0x8ea   : > { %v1507_v24 = vadd.f32 %v1505_v20, %v4035_v56 }
 0x8eb   : > { %v1506_v25 = vadd.f32 %v1504_v23, %v4037_v59 }
 0x8ec   : > { %v1511_v53 = vsel %vm1099_vm4, %v1507_v24, -inf }
 0x8ed   : > { %1512 = vmax.xlane.f32.xlu1 %v1511_v53  ;;  %v1508_v27 = vsel %vm1099_vm4, %v1506_v25, -inf }
 0x8ee   : > { %1509 = vmax.xlane.f32.xlu0 %v1508_v27 }
 0x8f2   : > { %1713 = vmax.xlane.f32.xlu0 %v1712_v32 }
 0x8f6   : > { %1716 = vmax.xlane.f32.xlu0 %v1715_v34 }
 0x97a   : > { %v1513_v37 = vpop.xlane.xlu1 %1512 }
 0x97b   : > { %v1510_v35 = vpop.xlane.xlu0 %1509  ;;  %v1515_v42 = vsub.f32 %v1507_v24, %v1513_v37 }
 0x97c   : > { %v1514_v36 = vsub.f32 %v1506_v25, %v1510_v35 }
 0x97d   : > { %v1518_v48 = vmul.f32 1.442695, %v1515_v42 }
 0x97e   : > { %v1516_v43 = vmul.f32 1.442695, %v1514_v36 }
 0x97f   : > { %v1714_v38 = vpop.xlane.xlu0 %1713 }
 0x980   : > { %v1718_v41 = vsub.f32 %v1710_v30, %v1714_v38 }
 0x982   : > { %v1720_v45 = vmul.f32 1.442695, %v1718_v41 }
 0x983   : > { %v1717_v46 = vpop.xlane.xlu0 %1716 }
 0x984   : > { %3143 = vpow2.f32 %v1720_v45  ;;  %v1719_v59 = vsub.f32 %v1711_v33, %v1717_v46 }
 0x985   : > { %3145 = vpow2.f32 %v1516_v43 }
 0x986   : > { %v1722_v50 = vmul.f32 1.442695, %v1719_v59 }
 0x988   : > { %3147 = vpow2.f32 %v1722_v50 }
 0x989   : > { %3149 = vpow2.f32 %v1518_v48 }
 0x98e   : > { %v3144_v56 = vpop.eup %3143 }
 0x98f   : > { %v1724_v51 = vsel %vm1099_vm4, %v3144_v56, 0.0  ;;  %v3146_v52 = vpop.eup %3145 }
 0x990   : > { %1725 = vadd.xlane.f32.xlu1 %v1724_v51  ;;  %v1520_v55 = vsel %vm1099_vm4, %v3146_v52, 0.0  ;;  %v3111_v51 = vld [vmem:[%s3970_s18] sm:$0xff]  }
 0x992   : > { %v3148_v54 = vpop.eup %3147 }
 0x993   : > { %v1727_v57 = vsel %vm1099_vm4, %v3148_v54, 0.0  ;;  %v3150_v58 = vpop.eup %3149 }
 0x994   : > { %1521 = vadd.xlane.f32.xlu1 %v1520_v55  ;;  %1728 = vadd.xlane.f32.xlu0 %v1727_v57  ;;  %v1523_v60 = vsel %vm1099_vm4, %v3150_v58, 0.0 }
 0x998   : > { %1524 = vadd.xlane.f32.xlu0 %v1523_v60 }
 0x9a5   : > { %3077 = vrot.lane.b32.xlu1 %v4020_v49, %s3504_s2 }
 0x9a9   : > { %3087 = vrot.lane.b32.xlu1 %v3086_v18, %s3505_s9 }
 0x9ae   : > { %3082 = vrot.lane.b32.xlu0 %v4020_v49, %s3506_s7 }
 0xa1d   : > { %v1726_v61 = vpop.xlane.xlu1 %1725 }
 0xa21   : > { %v1522_v44 = vpop.xlane.xlu1 %1521  ;;  %v1729_v62 = vpop.xlane.xlu0 %1728 }
 0xa22   : > { %3151 = vrcp.f32 %v1522_v44 }
 0xa23   : > { %3153 = vrcp.f32 %v1726_v61 }
 0xa25   : > { %v3078_v63 = vpop.permute.xlu1 %3077  ;;  %v1525_v0 = vpop.xlane.xlu0 %1524 }
 0xa26   : > { %v3080_v2 = vunpack.i.h.bf16 %v3078_v63  ;;  %v3079_v3 = vunpack.i.l.bf16 %v3078_v63  ;;  %3155 = vrcp.f32 %v1525_v0  ;;  %v3113_v63 = vld [vmem:[%s3970_s18 + $0x10] sm:$0xff]   ;;  %v3114_v0 = vld [vmem:[%s3970_s18 + $0x18] sm:$0xff]  }
 0xa27   : > { %3157 = vrcp.f32 %v1729_v62 }
 0xa28   : > { %v2901_v4 = vpack.c.bf16 %v3080_v2, %v3079_v3  ;;  %v3115_v2 = vld [vmem:[%s3970_s18 + $0x20] sm:$0xff]   ;;  %v3116_v3 = vld [vmem:[%s3970_s18 + $0x28] sm:$0xff]  }
 0xa29   : > { %v3083_v5 = vpop.permute.xlu0 %3082  ;;  %v3088_v23 = vpop.permute.xlu1 %3087 }
 0xa2a   : > { %v3085_v6 = vunpack.i.h.bf16 %v3083_v5  ;;  %v3084_v7 = vunpack.i.l.bf16 %v3083_v5  ;;  %2902 = vmatprep.subr.bf16.mxu1 %v2901_v4  ;;  %v3090_v25 = vunpack.i.h.bf16 %v3088_v23  ;;  %v3089_v53 = vunpack.i.l.bf16 %v3088_v23  ;;  %v3118_v5 = vld [vmem:[%s3970_s18 + $0x38] sm:$0xff]   ;;  %v3121_v23 = vld [vmem:[%s3972_s1 + $0x10] sm:$0xff]  }
 0xa2b   : > { %2904 = vmatpush3.bf16.msra.mxu1 %v2901_v4  ;;  %v3117_v4 = vld [vmem:[%s3970_s18 + $0x30] sm:$0xff]  }
 0xa2c   : > { %v3152_v8 = vpop.eup %3151  ;;  %v2911_v9 = vpack.c.bf16 %v3085_v6, %v3084_v7  ;;  %v1846_v32 = vsel %vm1011_vm2, %v4057_v28, %v3090_v25  ;;  %v1845_v33 = vsel %vm1011_vm2, %v4059_v29, %v3089_v53  ;;  %v2641_v28 = vld [vmem:[%s4362_s10] ss:$0 sm:$0xff]  ;;  %v3123_v25 = vld [vmem:[%s3972_s1 + $0x20] sm:$0xff]   ;;  %v3124_v53 = vld [vmem:[%s3972_s1 + $0x28] sm:$0xff]  }
 0xa2d   : > { %v1528_v49 = vmul.f32 %v3152_v8, %v3146_v52  ;;  %v3154_v10 = vpop.eup %3153  ;;  %v3112_v52 = vld [vmem:[%s3970_s18 + $0x8] sm:$0xff]  }
 0xa2e   : > { %2912 = vmatprep.subr.bf16.mxu1 %v2911_v9  ;;  %v1732_v14 = vmul.f32 %v3154_v10, %v3144_v56 }
 0xa2f   : > { %2803 = vmatprep.mubr.msk.f32.mxu1 %vm1099_vm4, %v1528_v49 }
 0xa30   : > { %v3156_v11 = vpop.eup %3155 }
 0xa31   : > { %v1529_v12 = vmul.f32 %v3156_v11, %v3150_v58  ;;  %v3158_v13 = vpop.eup %3157 }
 0xa32   : > { %v1733_v47 = vmul.f32 %v3158_v13, %v3148_v54 }
 0xa33   : > { %2804 = vmatmul.mubr.msk.f32.vlgmr.msra.gmra.mrb[10].mxu1 %vm1099_vm4, %v1529_v12  ;;  %v2645_v12 = vld [vmem:[%s4364_s16] ss:$0 sm:$0xff] }
 0xa34   : > { %2914 = vmatpush3.bf16.msra.mxu1 %v2911_v9  ;;  %2817 = vmatprep.mubr.msk.f32.mxu1 %vm1099_vm4, %v1732_v14 }
 0xa35   : > { %2828 = vmatprep.subr.bf16.mxu1 %v3493_v31 }
 0xa37   : > { %2818 = vmatmul.mubr.msk.f32.vlgmr.msra.gmra.mrb[12].mxu1 %vm1099_vm4, %v1733_v47 }
 0xa38   : > { %2844 = vmatprep.mubr.msk.bf16.mxu1 %vm3494_vm1, %v3493_v31  ;;  %2829 = vmatpush3.bf16.msra.mxu1 %v3111_v51 }
 0xa39   : > { %2830 = vmatprep.subr.bf16.mxu1 %v3493_v31 }
 0xa3c   : > { %2831 = vmatpush3.bf16.msra.mxu1 %v3112_v52 }
 0xa3d   : > { %2832 = vmatprep.subr.bf16.mxu1 %v3493_v31 }
 0xa40   : > { %2833 = vmatpush3.bf16.msra.mxu1 %v3113_v63 }
 0xa41   : > { %2834 = vmatprep.subr.bf16.mxu1 %v3493_v31 }
 0xa44   : > { %2835 = vmatpush3.bf16.msra.mxu1 %v3114_v0 }
 0xa45   : > { %2836 = vmatprep.subr.bf16.mxu1 %v3493_v31 }
 0xa48   : > { %2837 = vmatpush3.bf16.msra.mxu1 %v3115_v2 }
 0xa49   : > { %2838 = vmatprep.subr.bf16.mxu1 %v3493_v31 }
 0xa4c   : > { %2839 = vmatpush3.bf16.msra.mxu1 %v3116_v3 }
 0xa4d   : > { %2840 = vmatprep.subr.bf16.mxu1 %v3493_v31 }
 0xa50   : > { %2841 = vmatpush3.bf16.msra.mxu1 %v3117_v4 }
 0xa51   : > { %2842 = vmatprep.subr.bf16.mxu1 %v3493_v31 }
 0xa54   : > { %2843 = vmatpush3.bf16.msra.mxu1 %v3118_v5 }
 0xb06   : > { %v2805_v17 = vpop.f32.mrb[10].mxu1 }
 0xb07   : > { %v1608_v18 = vpop.f32.mrb[11].mxu1 }
 0xb08   : > { %v3091_v19 = vpack.i.bf16 %v2805_v17, %v1608_v18 }
 0xb0a   : > { %3092 = vrot.lane.b32.xlu1 %v3091_v19, %s3507_s19  ;;  %v2819_v20 = vpop.f32.mrb[12].mxu1 }
 0xb0b   : > { %v1812_v21 = vpop.f32.mrb[13].mxu1 }
 0xb0c   : > { %v3096_v22 = vpack.i.bf16 %v2819_v20, %v1812_v21  ;;  %v3119_v21 = vld [vmem:[%s3972_s1] sm:$0xff]  }
 0xb0e   : > { %3097 = vrot.lane.b32.xlu0 %v3096_v22, %s3508_s22  ;;  %v3120_v22 = vld [vmem:[%s3972_s1 + $0x8] sm:$0xff]  }
 0xb7c   : > { %v3093_v24 = vpop.permute.xlu1 %3092 }
 0xb7d   : > { %v3095_v26 = vunpack.i.h.bf16 %v3093_v24  ;;  %v3094_v27 = vunpack.i.l.bf16 %v3093_v24  ;;  %v3122_v24 = vld [vmem:[%s3972_s1 + $0x18] sm:$0xff]  }
 0xb7f   : > { %v1848_v36 = vsel %vm1099_vm4, %v1846_v32, %v3095_v26  ;;  %v1847_v37 = vsel %vm1099_vm4, %v1845_v33, %v3094_v27  ;;  %v3125_v26 = vld [vmem:[%s3972_s1 + $0x30] sm:$0xff]   ;;  %v3126_v27 = vld [vmem:[%s3972_s1 + $0x38] sm:$0xff]  }
 0xb80   : > { %v3098_v30 = vpop.permute.xlu0 %3097 }
 0xb81   : > { %v3100_v34 = vunpack.i.h.bf16 %v3098_v30  ;;  %v3099_v35 = vunpack.i.l.bf16 %v3098_v30  ;;  %v2647_v30 = vld [vmem:[%s822_s14] ss:$0 sm:$0xff] }
 0xb83   : > { %v1851_v38 = vsel %vm1849_vm5, %v1848_v36, %v3100_v34  ;;  %v1850_v41 = vsel %vm1849_vm5, %v1847_v37, %v3099_v35 }
 0xb84   : > { %v1852_v42 = vpack.c.bf16 %v1851_v38, %v1850_v41 }
 0xb86   : > { %2825 = vmatmul.mubr.msk.bf16.vlgmr.msra.gmra.mrb[8].mxu0 %vm1876_vm6, %v1852_v42 }
 0xb87   : > { %2864 = vmatprep.mubr.msk.bf16.mxu0 %vm3494_vm1, %v3493_v31  ;;  %2849 = vmatpush3.bf16.msra.mxu0 %v3119_v21 }
 0xb88   : > { %2850 = vmatprep.subr.bf16.mxu0 %v3493_v31 }
 0xb8b   : > { %2851 = vmatpush3.bf16.msra.mxu0 %v3120_v22 }
 0xb8c   : > { %2852 = vmatprep.subr.bf16.mxu0 %v3493_v31 }
 0xb8f   : > { %2853 = vmatpush3.bf16.msra.mxu0 %v3121_v23 }
 0xb90   : > { %2854 = vmatprep.subr.bf16.mxu0 %v3493_v31 }
 0xb93   : > { %2855 = vmatpush3.bf16.msra.mxu0 %v3122_v24 }
 0xb94   : > { %2856 = vmatprep.subr.bf16.mxu0 %v3493_v31 }
 0xb97   : > { %2857 = vmatpush3.bf16.msra.mxu0 %v3123_v25 }
 0xb98   : > { %2858 = vmatprep.subr.bf16.mxu0 %v3493_v31 }
 0xb9b   : > { %2859 = vmatpush3.bf16.msra.mxu0 %v3124_v53 }
 0xb9c   : > { %2860 = vmatprep.subr.bf16.mxu0 %v3493_v31 }
 0xb9f   : > { %2861 = vmatpush3.bf16.msra.mxu0 %v3125_v26 }
 0xba0   : > { %2862 = vmatprep.subr.bf16.mxu0 %v3493_v31 }
 0xba3   : > { %2863 = vmatpush3.bf16.msra.mxu0 %v3126_v27  ;;  %v2261_v27 = vld [vmem:[#allocation8] sm:$0xff] (!%p2667_p13) }
 0xc59   : > { %v1914_v29 = vpop.f32.mrb[8].mxu0 }
 0xc5a   : > { %v1915_v43 = vadd.f32 %v2641_v28, %v1914_v29  ;;  %v2826_v45 = vpop.f32.mrb[9].mxu0 }
 0xc5b   : > { %v1917_v46 = vpop.f32.mrb[10].mxu0 }
 0xc5c   : > { %v1918_v59 = vadd.f32 %v2641_v28, %v1917_v46  ;;  %v2827_v48 = vpop.f32.mrb[11].mxu0  ;;  %v1921_v50 = vadd.f32 %v1915_v43, %v4000_v39 }
 0xc5e   : > { %1925 = vadd.xlane.f32.xlu1 %v1921_v50  ;;  %v1922_v56 = vadd.f32 %v1918_v59, %v4002_v40 }
 0xc60   : > { %1927 = vadd.xlane.f32.xlu0 %v1922_v56 }
 0xceb   : > { %v1926_v54 = vpop.xlane.xlu1 %1925 }
 0xcec   : > { %v1929_v55 = vmul.f32 0.03125, %v1926_v54 }
 0xced   : > { %v1928_v57 = vpop.xlane.xlu0 %1927 }
 0xcee   : > { %v1931_v58 = vsub.f32 %v1921_v50, %v1929_v55  ;;  %v1930_v39 = vmul.f32 0.03125, %v1928_v57 }
 0xcf0   : > { %v1932_v60 = vsub.f32 %v1922_v56, %v1930_v39  ;;  %v1935_v40 = vsel %vm835_vm0, %v1931_v58, 0.0  ;;  %v2656_v39 = vld [vmem:[%s825_s17] ss:$0 sm:$0xff] }
 0xcf1   : > { %v1937_v61 = vmul.f32 %v1935_v40, %v1935_v40 }
 0xcf2   : > { %v1936_v44 = vsel %vm835_vm0, %v1932_v60, 0.0 }
 0xcf3   : > { %1939 = vadd.xlane.f32.xlu0 %v1937_v61  ;;  %v1938_v62 = vmul.f32 %v1936_v44, %v1936_v44 }
 0xcf5   : > { %1941 = vadd.xlane.f32.xlu1 %v1938_v62 }
 0xd80   : > { %v1940_v6 = vpop.xlane.xlu0 %1939 }
 0xd81   : > { %v1943_v7 = vmul.f32 0.03125, %v1940_v6 }
 0xd82   : > { %v1942_v8 = vpop.xlane.xlu1 %1941 }
 0xd83   : > { %v1945_v9 = vadd.f32 1e-12, %v1943_v7  ;;  %v1944_v49 = vmul.f32 0.03125, %v1942_v8 }
 0xd85   : > { %3159 = vrsqrt.f32 %v1945_v9  ;;  %v1946_v10 = vadd.f32 1e-12, %v1944_v49 }
 0xd87   : > { %3161 = vrsqrt.f32 %v1946_v10 }
 0xd8f   : > { %v3160_v11 = vpop.eup %3159 }
 0xd90   : > { %v1949_v13 = vmul.f32 %v3160_v11, %v1935_v40 }
 0xd91   : > { %v3162_v14 = vpop.eup %3161 }
 0xd92   : > { %v1950_v47 = vmul.f32 %v3162_v14, %v1936_v44  ;;  %v1957_v15 = vmul.f32 %v2645_v12, %v1949_v13 }
 0xd94   : > { %v1958_v17 = vmul.f32 %v2645_v12, %v1950_v47  ;;  %v4167_v18 = vadd.f32 %v2646_v16, %v1957_v15 }
 0xd96   : > { %v4169_v19 = vadd.f32 %v2646_v16, %v1958_v17 }
 0xd98   : > { %v1967_v20 = vpack.c.bf16 %v4169_v19, %v4167_v18 }
 0xd9a   : > { %2845 = vmatmul.mubr.bf16.vlgmr.msra.gmra.mrb[16].mxu1 %v1967_v20  ;;  %v2666_v20 = vld [vmem:[%s831_s27] ss:$0 sm:$0xff] }
 0xe6d   : > { %v2073_v32 = vpop.f32.mrb[16].mxu1 }
 0xe6e   : > { %v2074_v33 = vadd.f32 %v2647_v30, %v2073_v32  ;;  %v2846_v34 = vpop.f32.mrb[17].mxu1  ;;  %v2262_v32 = vld [vmem:[#allocation8 + $0x8] sm:$0xff] (!%p2667_p13) }
 0xe6f   : > { %v2076_v35 = vpop.f32.mrb[18].mxu1 }
 0xe70   : > { %v2080_v36 = vmul.f32 %v2074_v33, %v2074_v33  ;;  %v2077_v37 = vadd.f32 %v2647_v30, %v2076_v35  ;;  %v2847_v38 = vpop.f32.mrb[19].mxu1 }
 0xe72   : > { %v2082_v41 = vmul.f32 %v2080_v36, %v2074_v33  ;;  %v2081_v42 = vmul.f32 %v2077_v37, %v2077_v37 }
 0xe74   : > { %v2084_v28 = vmul.f32 0.044715, %v2082_v41  ;;  %v2083_v29 = vmul.f32 %v2081_v42, %v2077_v37 }
 0xe76   : > { %v2086_v43 = vadd.f32 %v2084_v28, %v2074_v33  ;;  %v2085_v31 = vmul.f32 0.044715, %v2083_v29 }
 0xe78   : > { %v2088_v45 = vmul.f32 0.7978846, %v2086_v43  ;;  %v2087_v46 = vadd.f32 %v2085_v31, %v2077_v37 }
 0xe7a   : > { %3163 = vtanh.f32 %v2088_v45  ;;  %v2089_v59 = vmul.f32 0.7978846, %v2087_v46 }
 0xe7c   : > { %3165 = vtanh.f32 %v2089_v59 }
 0xe84   : > { %v3164_v48 = vpop.eup %3163 }
 0xe85   : > { %v2092_v50 = vadd.f32 1.0, %v3164_v48 }
 0xe86   : > { %v3166_v56 = vpop.eup %3165 }
 0xe87   : > { %v2094_v51 = vmul.f32 0.5, %v2092_v50  ;;  %v2093_v52 = vadd.f32 1.0, %v3166_v56 }
 0xe89   : > { %v2095_v54 = vmul.f32 0.5, %v2093_v52  ;;  %v2096_v55 = vmul.f32 %v2094_v51, %v2074_v33 }
 0xe8b   : > { %v2097_v57 = vmul.f32 %v2095_v54, %v2077_v37 }
 0xe8d   : > { %v2098_v58 = vpack.c.bf16 %v2097_v57, %v2096_v55 }
 0xe8f   : > { %2865 = vmatmul.mubr.bf16.vlgmr.msra.gmra.mrb[12].mxu0 %v2098_v58 }
 0xe90   : > { %2872 = vmatprep.mubr.msk.f32.mxu0 (!%p2667_p13), %vm1099_vm4, %v2261_v27 }
 0xf62   : > { %v2204_v60 = vpop.f32.mrb[12].mxu0 }
 0xf63   : > { %v2205_v40 = vadd.f32 %v2656_v39, %v2204_v60  ;;  %v2866_v61 = vpop.f32.mrb[13].mxu0 }
 0xf64   : > { %v2207_v44 = vpop.f32.mrb[14].mxu0 }
 0xf65   : > { %v2208_v62 = vadd.f32 %v2656_v39, %v2207_v44  ;;  %v2867_v63 = vpop.f32.mrb[15].mxu0  ;;  %v2211_v0 = vadd.f32 %v2205_v40, %v4167_v18  ;;  %v2665_v18 = vld [vmem:[%s828_s11] ss:$0 sm:$0xff] }
 0xf67   : > { %2215 = vadd.xlane.f32.xlu0 %v2211_v0  ;;  %v2212_v2 = vadd.f32 %v2208_v62, %v4169_v19 }
 0xf69   : > { %2217 = vadd.xlane.f32.xlu1 %v2212_v2 }
 0xff4   : > { %v2216_v3 = vpop.xlane.xlu0 %2215 }
 0xff5   : > { %v2219_v4 = vmul.f32 0.03125, %v2216_v3 }
 0xff6   : > { %v2218_v5 = vpop.xlane.xlu1 %2217 }
 0xff7   : > { %v2221_v6 = vsub.f32 %v2211_v0, %v2219_v4  ;;  %v2220_v7 = vmul.f32 0.03125, %v2218_v5 }
 0xff9   : > { %v2222_v8 = vsub.f32 %v2212_v2, %v2220_v7  ;;  %v2223_v9 = vsel %vm835_vm0, %v2221_v6, 0.0 }
 0xffa   : > { %v2225_v49 = vmul.f32 %v2223_v9, %v2223_v9 }
 0xffb   : > { %v2224_v10 = vsel %vm835_vm0, %v2222_v8, 0.0 }
 0xffc   : > { %2227 = vadd.xlane.f32.xlu0 %v2225_v49  ;;  %v2226_v11 = vmul.f32 %v2224_v10, %v2224_v10 }
 0xffe   : > { %2229 = vadd.xlane.f32.xlu1 %v2226_v11 }
0x1089   : > { %v2228_v12 = vpop.xlane.xlu0 %2227 }
0x108a   : > { %v2231_v13 = vmul.f32 0.03125, %v2228_v12 }
0x108b   : > { %v2230_v14 = vpop.xlane.xlu1 %2229 }
0x108c   : > { %v2233_v47 = vadd.f32 1e-12, %v2231_v13  ;;  %v2232_v15 = vmul.f32 0.03125, %v2230_v14 }
0x108e   : > { %3167 = vrsqrt.f32 %v2233_v47  ;;  %v2234_v16 = vadd.f32 1e-12, %v2232_v15 }
0x1090   : > { %3169 = vrsqrt.f32 %v2234_v16 }
0x1098   : > { %v3168_v17 = vpop.eup %3167 }
0x1099   : > { %v2237_v1 = vmul.f32 %v3168_v17, %v2223_v9 }
0x109a   : > { %v3170_v19 = vpop.eup %3169 }
0x109b   : > { %v2245_v21 = vmul.f32 %v2665_v18, %v2237_v1  ;;  %v2238_v22 = vmul.f32 %v3170_v19, %v2224_v10  ;;  %2260 = sbr.rel (%p2667_p13) target bundleno = 4485 (0x1185), region = 128 }
0x109d   : > { %v2253_v23 = vadd.f32 %v2666_v20, %v2245_v21  ;;  %v2246_v24 = vmul.f32 %v2665_v18, %v2238_v22 }
0x109f   : > { %2255 = vst [vmem:[#allocation2] sm:$0xff] %v2253_v23  ;;  %v2254_v25 = vadd.f32 %v2666_v20, %v2246_v24 }
0x10a1   : > { %2256 = vst [vmem:[#allocation2 + $0x8] sm:$0xff] %v2254_v25 }
0x10a6   : > { %v2263_v53 = vld [vmem:[#allocation2] sm:$0xff] }
0x10a8   : > { %v2264_v26 = vld [vmem:[#allocation2 + $0x8] sm:$0xff] }
0x10a9   : > { %v2915_v30 = vpack.c.bf16 %v2264_v26, %v2263_v53 }
0x10ab   : > { %2916 = vmatprep.subr.bf16.mxu0 %v2915_v30 }
0x10ac   : > { %2918 = vmatpush3.bf16.msra.mxu0 %v2915_v30 }
0x10af   : > { %2873 = vmatmul.mubr.msk.f32.vlgmr.msra.gmra.mrb[0].mxu0 %vm1099_vm4, %v2262_v32 }
0x1182   : > { %v2874_v33 = vpop.f32.mrb[0].mxu0 }
0x1183   : > { %2347 = vst [vmem:[#allocation15 + $0x8] sm:$0xff] %v2874_v33  ;;  %v2337_v34 = vpop.f32.mrb[1].mxu0 }
0x1184   : > { %2346 = vst [vmem:[#allocation15] sm:$0xff] %v2337_v34 }
0x1185 PF: > { %p2982_p3 = scmp.eq.s32.totalorder %s3620_s28, 1  ;;  %s3509_s5 = smov [#allocation15]  }
0x1186   : > { %s2354_s11 = sshll.u32 %s3509_s5, 4  ;;  %s2355_s11 = int_to_ptr.vmem [resolvable:$true] %s2354_s11 }
0x1187   : > { %s3403_s27 = scalar_lea.vmem %s2355_s11, 256  ;;  %p3410_p7 = scmp.lt.s32.totalorder %s2355_s11, %s2355_s11 }
0x1188   : > { %p3404_p2 = scmp.ne.s32.totalorder %s2355_s11, %s3403_s27  ;;  %p3411_p8 = scmp.lt.s32.totalorder %s3403_s27, %s3403_s27 }
0x118a   : > { %p3405_p9 = pnand %p3404_p2, %p2982_p3  ;;  %p3412_p10 = por %p3411_p8, %p3410_p7 }
0x118c   : > { %p3406_p5 = pneg %p3405_p9 }
0x118e   : > { %p3413_p1 = pnand %p3412_p10, %p3406_p5 }
0x1190   : > { %3416 = shalt.err (!%p3413_p1)
}
0x1191   : > { %s4370_s10 = sld [smem:[#allocation39_spill]] }
0x1197   : > { %s3417_s3 = scalar_lea.hbm %s4370_s10, 256 }
0x1198   : > { %p3418_p4 = scmp.ne.s32.totalorder %s4370_s10, %s3417_s3  ;;  %p3423_p12 = scmp.lt.u32.totalorder %s3417_s3, %s4370_s10 }
0x119a   : > { %p3419_p11 = pnand %p3418_p4, %p2982_p3 }
0x119c   : > { %p3420_p6 = pneg %p3419_p11 }
0x119e   : > { %p3425_p0 = pnand %p3423_p12, %p3420_p6 }
0x11a0   : > { %3428 = shalt.err (!%p3425_p0)
}
0x11a1   : > { %s3510_s8 = smov 128  }
0x11a2   : > { %2944 = dma.vmem_to_hbm [thread:$0]  (%p2982_p3), %s2355_s11, 256, %s4370_s10, [#allocation5], %s3510_s8, %s3510_s8, %s3505_s9  }
0x11a3   : > { %3462 = dma.done.wait (%p2982_p3), [#allocation5], 256  }
0x11a4   : > { %3464 = vsyncadd (%p2982_p3), [#allocation5], 4294967040 }
0x11a5 PF: > { %s4371_s27 = sld [smem:[#allocation22_spill]]  ;;  %s4372_s15 = sld [smem:[#allocation23_spill]] }
0x11a6   : > { %s4373_s24 = smov %s3471_s25  ;;  %s4374_s25 = smov %s3475_s26 }
0x11ab   : > { %p28_p13 = scmp.ge.s32.totalorder %s4371_s27, 4   ;;  %s4375_s26 = smov %s4372_s15 }
0x11ad   :  { %30 = sbr.rel (!%p28_p13) target bundleno = 22 (0x16), region = 205 }
0x11b4   :  { %2370 = vsyncpa [#allocation4], 1 }
0x11b5   :  { %2372 = vsyncpa [#allocation4 + $0x1], 1 }
0x11b6   :  { %2373 = vsyncpa [#allocation7], 1 }
0x11b7   :  { %2374 = vsyncpa [#allocation10], 1 }
0x11b8   :  { %2375 = vsyncpa [#allocation5], 1 }
0x11b9   :  { %2377 = vsyncpa [#allocation5 + $0x1], 1 }

</bundles_post_ra>
